<compile_context>
chip_gen: v6e
topology: v6e:2x2x1
jax: 0.10.0
libtpu: 0.0.40
codegen_flags: <defaults>
</compile_context>

<pallas_src>
from functools import partial

import jax
import jax.numpy as jnp
from jax.experimental import pallas as pl
from jax.experimental.pallas import tpu as pltpu


def _decoder_kernel(x_ref, w4_ref, b4_ref, w5_ref, b5_ref, w6_ref, b6_ref,
                    o_ref, *, apply_sigmoid: bool):
    # fc4 + ReLU  (bf16 operands on the MXU, f32 accumulate, f32 epilogue)
    h = jnp.dot(x_ref[...].astype(jnp.bfloat16), w4_ref[...],
                preferred_element_type=jnp.float32)
    h = jnp.maximum(h + b4_ref[...], 0.0)
    # fc5 + ReLU
    h = jnp.dot(h.astype(jnp.bfloat16), w5_ref[...],
                preferred_element_type=jnp.float32)
    h = jnp.maximum(h + b5_ref[...], 0.0)
    # fc6 (NO ReLU, matching the PyTorch module), optional sigmoid
    h = jnp.dot(h.astype(jnp.bfloat16), w6_ref[...],
                preferred_element_type=jnp.float32)
    h = h + b6_ref[...]
    if apply_sigmoid:
        h = jax.nn.sigmoid(h)
    o_ref[...] = h.astype(o_ref.dtype)


def simple_decoder(enc, params, *, apply_sigmoid=False, block_b=256):
    """enc: [B, input_dim] float32. params: dict of w4,b4,w5,b5,w6,b6
    (weights stored (in_dim, out_dim), biases (1, out_dim))."""
    B, d0 = enc.shape
    w4, b4 = params["w4"], params["b4"]
    w5, b5 = params["w5"], params["b5"]
    w6, b6 = params["w6"], params["b6"]
    d1, d2, d3 = w4.shape[1], w5.shape[1], w6.shape[1]

    # Cast weights to bf16 once outside the kernel; biases stay f32 so the
    # bias-add / ReLU epilogue runs in f32 (important on v5e: no bf16 VPU).
    w4 = w4.astype(jnp.bfloat16)
    w5 = w5.astype(jnp.bfloat16)
    w6 = w6.astype(jnp.bfloat16)

    # Batch tile: multiple of 8 (f32 sublane), capped at block_b.
    tb = min(block_b, ((B + 7) // 8) * 8)
    tb = ((tb + 7) // 8) * 8
    n_blocks = pl.cdiv(B, tb)
    b_pad = n_blocks * tb
    if b_pad != B:
        enc = jnp.pad(enc, ((0, b_pad - B), (0, 0)))

    flops = 2 * b_pad * (d0 * d1 + d1 * d2 + d2 * d3)
    bytes_accessed = (4 * b_pad * d0                      # activations in (f32)
                      + 2 * (d0 * d1 + d1 * d2 + d2 * d3)  # bf16 weights
                      + 4 * (d1 + d2 + d3)                 # f32 biases
                      + 4 * b_pad * d3)                    # output (f32)
    transcendentals = b_pad * d3 if apply_sigmoid else 0

    out = pl.pallas_call(
        partial(_decoder_kernel, apply_sigmoid=apply_sigmoid),
        out_shape=jax.ShapeDtypeStruct((b_pad, d3), jnp.float32),
        grid_spec=pltpu.PrefetchScalarGridSpec(
            num_scalar_prefetch=0,
            grid=(n_blocks,),
            in_specs=[
                pl.BlockSpec((tb, d0), lambda i: (i, 0)),   # activations: tiled over batch
                pl.BlockSpec((d0, d1), lambda i: (0, 0)),   # weights/biases: VMEM-resident
                pl.BlockSpec((1, d1), lambda i: (0, 0)),
                pl.BlockSpec((d1, d2), lambda i: (0, 0)),
                pl.BlockSpec((1, d2), lambda i: (0, 0)),
                pl.BlockSpec((d2, d3), lambda i: (0, 0)),
                pl.BlockSpec((1, d3), lambda i: (0, 0)),
            ],
            out_specs=pl.BlockSpec((tb, d3), lambda i: (i, 0)),
        ),
        compiler_params=pltpu.CompilerParams(
            dimension_semantics=("parallel",),   # megacore sharding on v7x
        ),
        cost_estimate=pl.CostEstimate(
            flops=flops,
            transcendentals=transcendentals,
            bytes_accessed=bytes_accessed,
        ),
    )(enc, w4, b4, w5, b5, w6, b6)

    return out[:B]


def init_params(key, input_dim):
    """Deterministic init; Linear layer shapes follow the PyTorch module:
    fc4: input_dim -> 2*input_dim, fc5: -> 4*input_dim, fc6: -> 8*input_dim."""
    d0, d1, d2, d3 = input_dim, input_dim * 2, input_dim * 4, input_dim * 8
    ks = jax.random.split(key, 6)

    def lin(kw, kb, din, dout):
        bound = 1.0 / jnp.sqrt(din)
        w = jax.random.uniform(kw, (din, dout), jnp.float32, -bound, bound)
        b = jax.random.uniform(kb, (1, dout), jnp.float32, -bound, bound)
        return w, b

    w4, b4 = lin(ks[0], ks[1], d0, d1)
    w5, b5 = lin(ks[2], ks[3], d1, d2)
    w6, b6 = lin(ks[4], ks[5], d2, d3)
    return {"w4": w4, "b4": b4, "w5": w5, "b5": b5, "w6": w6, "b6": b6}


def _reference(enc, p, apply_sigmoid=False):
    h = jnp.maximum(enc @ p["w4"] + p["b4"], 0.0)
    h = jnp.maximum(h @ p["w5"] + p["b5"], 0.0)
    h = h @ p["w6"] + p["b6"]
    if apply_sigmoid:
        h = jax.nn.sigmoid(h)
    return h


if __name__ == "__main__":
    key = jax.random.PRNGKey(0)
    kx, kp = jax.random.split(key)

    # small latent input: [B=2, input_dim=128] -> 256 -> 512 -> 1024
    B, input_dim = 2, 128
    enc = jax.random.normal(kx, (B, input_dim), dtype=jnp.float32)
    params = init_params(kp, input_dim)

    # default path (no sigmoid, like the PyTorch default)
    out = simple_decoder(enc, params, apply_sigmoid=False)
    out = jax.block_until_ready(out)
    ref = _reference(enc, params, apply_sigmoid=False)
    assert out.shape == (B, input_dim * 8)
    # bf16 weights on the MXU -> loosened tolerance vs the f32 reference
    assert jnp.allclose(out, ref, atol=5e-2, rtol=5e-2)

    # sigmoid path
    out_s = simple_decoder(enc, params, apply_sigmoid=True)
    out_s = jax.block_until_ready(out_s)
    ref_s = _reference(enc, params, apply_sigmoid=True)
    assert jnp.allclose(out_s, ref_s, atol=5e-2, rtol=5e-2)

    print("KERNEL_OK")
</pallas_src>

<mosaic_0001>
module attributes {stable_mosaic.version = 11 : i64} {
  func.func @_decoder_kernel(%arg0: i32, %arg1: memref<8x128xf32, #tpu.memory_space<vmem>>, %arg2: memref<128x256xbf16, #tpu.memory_space<vmem>>, %arg3: memref<1x256xf32, #tpu.memory_space<vmem>>, %arg4: memref<256x512xbf16, #tpu.memory_space<vmem>>, %arg5: memref<1x512xf32, #tpu.memory_space<vmem>>, %arg6: memref<512x1024xbf16, #tpu.memory_space<vmem>>, %arg7: memref<1x1024xf32, #tpu.memory_space<vmem>>, %arg8: memref<8x1024xf32, #tpu.memory_space<vmem>>) attributes {dimension_semantics = [#tpu.dimension_semantics<parallel>], iteration_bounds = array<i64: 1>, scalar_prefetch = 0 : i64, scratch_operands = 0 : i64, tpu.core_type = #tpu.core_type<tc>, window_params = [{transform_indices = @transform_0, window_bounds = array<i64: 8, 128>}, {pipeline_mode = #tpu.pipeline_mode<synchronous>, transform_indices = @transform_1, window_bounds = array<i64: 128, 256>}, {pipeline_mode = #tpu.pipeline_mode<synchronous>, transform_indices = @transform_2, window_bounds = array<i64: 1, 256>}, {pipeline_mode = #tpu.pipeline_mode<synchronous>, transform_indices = @transform_3, window_bounds = array<i64: 256, 512>}, {pipeline_mode = #tpu.pipeline_mode<synchronous>, transform_indices = @transform_4, window_bounds = array<i64: 1, 512>}, {pipeline_mode = #tpu.pipeline_mode<synchronous>, transform_indices = @transform_5, window_bounds = array<i64: 512, 1024>}, {pipeline_mode = #tpu.pipeline_mode<synchronous>, transform_indices = @transform_6, window_bounds = array<i64: 1, 1024>}, {transform_indices = @transform_7, window_bounds = array<i64: 8, 1024>}]} {
    %c0 = arith.constant 0 : index
    %c0_0 = arith.constant 0 : index
    %0 = vector.load %arg1[%c0, %c0_0] : memref<8x128xf32, #tpu.memory_space<vmem>>, vector<8x128xf32>
    %1 = arith.truncf %0 : vector<8x128xf32> to vector<8x128xbf16>
    %c0_1 = arith.constant 0 : index
    %c0_2 = arith.constant 0 : index
    %2 = vector.load %arg2[%c0_1, %c0_2] : memref<128x256xbf16, #tpu.memory_space<vmem>>, vector<128x256xbf16>
    %cst = arith.constant dense<0.000000e+00> : vector<8x256xf32>
    %3 = tpu.matmul %1, %2, %cst {dimension_numbers = #tpu.dot_dimension_numbers<[1], [0], [0], [1], [0, 0, 1, 1], [], []>} : vector<8x128xbf16>, vector<128x256xbf16>, vector<8x256xf32> -> vector<8x256xf32>
    %c0_3 = arith.constant 0 : index
    %c0_4 = arith.constant 0 : index
    %4 = vector.load %arg3[%c0_3, %c0_4] : memref<1x256xf32, #tpu.memory_space<vmem>>, vector<1x256xf32>
    %5 = vector.broadcast %4 : vector<1x256xf32> to vector<8x256xf32>
    %6 = arith.addf %3, %5 : vector<8x256xf32>
    %cst_5 = arith.constant 0.000000e+00 : f32
    %7 = vector.broadcast %cst_5 : f32 to vector<8x256xf32>
    %8 = arith.maximumf %6, %7 : vector<8x256xf32>
    %9 = arith.truncf %8 : vector<8x256xf32> to vector<8x256xbf16>
    %c0_6 = arith.constant 0 : index
    %c0_7 = arith.constant 0 : index
    %10 = vector.load %arg4[%c0_6, %c0_7] : memref<256x512xbf16, #tpu.memory_space<vmem>>, vector<256x512xbf16>
    %cst_8 = arith.constant dense<0.000000e+00> : vector<8x512xf32>
    %11 = tpu.matmul %9, %10, %cst_8 {dimension_numbers = #tpu.dot_dimension_numbers<[1], [0], [0], [1], [0, 0, 1, 1], [], []>} : vector<8x256xbf16>, vector<256x512xbf16>, vector<8x512xf32> -> vector<8x512xf32>
    %c0_9 = arith.constant 0 : index
    %c0_10 = arith.constant 0 : index
    %12 = vector.load %arg5[%c0_9, %c0_10] : memref<1x512xf32, #tpu.memory_space<vmem>>, vector<1x512xf32>
    %13 = vector.broadcast %12 : vector<1x512xf32> to vector<8x512xf32>
    %14 = arith.addf %11, %13 : vector<8x512xf32>
    %cst_11 = arith.constant 0.000000e+00 : f32
    %15 = vector.broadcast %cst_11 : f32 to vector<8x512xf32>
    %16 = arith.maximumf %14, %15 : vector<8x512xf32>
    %17 = arith.truncf %16 : vector<8x512xf32> to vector<8x512xbf16>
    %c0_12 = arith.constant 0 : index
    %c0_13 = arith.constant 0 : index
    %18 = vector.load %arg6[%c0_12, %c0_13] : memref<512x1024xbf16, #tpu.memory_space<vmem>>, vector<512x1024xbf16>
    %cst_14 = arith.constant dense<0.000000e+00> : vector<8x1024xf32>
    %19 = tpu.matmul %17, %18, %cst_14 {dimension_numbers = #tpu.dot_dimension_numbers<[1], [0], [0], [1], [0, 0, 1, 1], [], []>} : vector<8x512xbf16>, vector<512x1024xbf16>, vector<8x1024xf32> -> vector<8x1024xf32>
    %c0_15 = arith.constant 0 : index
    %c0_16 = arith.constant 0 : index
    %20 = vector.load %arg7[%c0_15, %c0_16] : memref<1x1024xf32, #tpu.memory_space<vmem>>, vector<1x1024xf32>
    %21 = vector.broadcast %20 : vector<1x1024xf32> to vector<8x1024xf32>
    %22 = arith.addf %19, %21 : vector<8x1024xf32>
    %c0_17 = arith.constant 0 : index
    %c0_18 = arith.constant 0 : index
    %23 = vector.load %arg8[%c0_17, %c0_18] : memref<8x1024xf32, #tpu.memory_space<vmem>>, vector<8x1024xf32>
    tpu.vector_store %arg8[%c0_17, %c0_18], %22 {strides = array<i32>} : memref<8x1024xf32, #tpu.memory_space<vmem>>, vector<8x1024xf32>,
    return
  }
  func.func @transform_0(%arg0: i32) -> (i32, i32) {
    %c0_i32 = arith.constant 0 : i32
    %c0_i32_0 = arith.constant 0 : i32
    return %arg0, %c0_i32 : i32, i32
  }
  func.func @transform_1(%arg0: i32) -> (i32, i32) {
    %c0_i32 = arith.constant 0 : i32
    %c0_i32_0 = arith.constant 0 : i32
    %c0_i32_1 = arith.constant 0 : i32
    return %c0_i32, %c0_i32_0 : i32, i32
  }
  func.func @transform_2(%arg0: i32) -> (i32, i32) {
    %c0_i32 = arith.constant 0 : i32
    %c0_i32_0 = arith.constant 0 : i32
    %c0_i32_1 = arith.constant 0 : i32
    return %c0_i32, %c0_i32_0 : i32, i32
  }
  func.func @transform_3(%arg0: i32) -> (i32, i32) {
    %c0_i32 = arith.constant 0 : i32
    %c0_i32_0 = arith.constant 0 : i32
    %c0_i32_1 = arith.constant 0 : i32
    return %c0_i32, %c0_i32_0 : i32, i32
  }
  func.func @transform_4(%arg0: i32) -> (i32, i32) {
    %c0_i32 = arith.constant 0 : i32
    %c0_i32_0 = arith.constant 0 : i32
    %c0_i32_1 = arith.constant 0 : i32
    return %c0_i32, %c0_i32_0 : i32, i32
  }
  func.func @transform_5(%arg0: i32) -> (i32, i32) {
    %c0_i32 = arith.constant 0 : i32
    %c0_i32_0 = arith.constant 0 : i32
    %c0_i32_1 = arith.constant 0 : i32
    return %c0_i32, %c0_i32_0 : i32, i32
  }
  func.func @transform_6(%arg0: i32) -> (i32, i32) {
    %c0_i32 = arith.constant 0 : i32
    %c0_i32_0 = arith.constant 0 : i32
    %c0_i32_1 = arith.constant 0 : i32
    return %c0_i32, %c0_i32_0 : i32, i32
  }
  func.func @transform_7(%arg0: i32) -> (i32, i32) {
    %c0_i32 = arith.constant 0 : i32
    %c0_i32_0 = arith.constant 0 : i32
    return %arg0, %c0_i32 : i32, i32
  }
}

</mosaic_0001>

<bundles_post_ra>
// kernel: tpu_custom_call.1
= control target key start
LH: loop header
LB: loop body
LE: loop exit
PB: predicated region body
PF: predicated region fallthrough
CT: control target
= control target key end

     0   :  { %12 = vsyncpa [#allocation3], 0  ;;  %s3400_s0 = inlined_call_operand.hbm [shape: f32[8,128], index: 0, kind: input, shape index: {}]   ;;  %s3401_s1 = inlined_call_operand.hbm [shape: bf16[128,256], index: 1, kind: input, shape index: {}]   ;;  %s3402_s2 = inlined_call_operand.vmem [shape: f32[1,256], index: 2, kind: input, shape index: {}]   ;;  %s3403_s3 = inlined_call_operand.hbm [shape: bf16[256,512], index: 3, kind: input, shape index: {}]   ;;  %s3404_s4 = inlined_call_operand.hbm [shape: f32[1,512], index: 4, kind: input, shape index: {}]   ;;  %s3405_s5 = inlined_call_operand.hbm [shape: bf16[512,1024], index: 5, kind: input, shape index: {}]   ;;  %s3406_s6 = inlined_call_operand.vmem [shape: f32[1,1024], index: 6, kind: input, shape index: {}]   ;;  %s3407_s7 = inlined_call_operand.hbm [shape: f32[8,1024], index: 7, kind: output, shape index: {}]  }
   0x1   :  { %13 = vsyncpa [#allocation6], 0 }
   0x2   :  { %14 = vsyncpa [#allocation9], 0 }
   0x3   :  { %15 = vsyncpa [#allocation4], 0  ;;  %s3271_s24 = smov [#allocation5]  }
   0x4   :  { %s31_s25 = sshll.u32 %s3271_s24, 4  ;;  %s32_s25 = int_to_ptr.vmem [resolvable:$true] %s31_s25 }
   0x5   :  { %s3151_s26 = scalar_lea.vmem %s32_s25, 2048  ;;  %p3156_p1 = scmp.lt.s32.totalorder %s32_s25, %s32_s25 }
   0x6   :  { %p3152_p0 = scmp.ne.s32.totalorder %s32_s25, %s3151_s26  ;;  %p3157_p2 = scmp.lt.s32.totalorder %s3151_s26, %s3151_s26 }
   0x8   :  { %p3158_p3 = por %p3157_p2, %p3156_p1 }
   0xa   :  { %p3159_p4 = pnand %p3158_p3, %p3152_p0 }
   0xc   :  { %3162 = shalt.err (!%p3159_p4)
}
   0xd   :  { %s3272_s27 = smov 128   ;;  %s3273_s28 = smov 8  }
   0xe   :  { %37 = dma.hbm_to_vmem [thread:$0]  %s3401_s1, 2048, %s32_s25, [#allocation6], %s3272_s27, %s3272_s27, %s3273_s28  }
   0xf   :  { %s3274_s8 = smov [#allocation8]   ;;  %s3275_s10 = smov [#allocation2]  }
  0x10   :  { %s58_s9 = sshll.u32 %s3274_s8, 4  ;;  %s22_s11 = sshll.u32 %s3275_s10, 4  ;;  %s59_s9 = int_to_ptr.vmem [resolvable:$true] %s58_s9  ;;  %s23_s11 = int_to_ptr.vmem [resolvable:$true] %s22_s11 }
  0x11   :  { %s3171_s12 = scalar_lea.vmem %s59_s9, 64  ;;  %p3176_p6 = scmp.lt.s32.totalorder %s59_s9, %s59_s9 }
  0x12   :  { %p3172_p5 = scmp.ne.s32.totalorder %s59_s9, %s3171_s12  ;;  %p3177_p7 = scmp.lt.s32.totalorder %s3171_s12, %s3171_s12 }
  0x14   :  { %p3178_p8 = por %p3177_p7, %p3176_p6 }
  0x16   :  { %p3179_p9 = pnand %p3178_p8, %p3172_p5 }
  0x18   :  { %3182 = shalt.err (!%p3179_p9)
}
  0x19   :  { %61 = dma.hbm_to_vmem [thread:$0]  %s3404_s4, 64, %s59_s9, [#allocation9]  }
  0x1a   :  { %s3191_s15 = scalar_lea.vmem %s23_s11, 128  ;;  %p3196_p11 = scmp.lt.s32.totalorder %s23_s11, %s23_s11 }
  0x1b   :  { %p3192_p10 = scmp.ne.s32.totalorder %s23_s11, %s3191_s15  ;;  %p3197_p12 = scmp.lt.s32.totalorder %s3191_s15, %s3191_s15 }
  0x1d   :  { %p3198_p13 = por %p3197_p12, %p3196_p11 }
  0x1f   :  { %p3199_p0 = pnand %p3198_p13, %p3192_p10 }
  0x21   :  { %3202 = shalt.err (!%p3199_p0)
}
  0x22   :  { %25 = dma.hbm_to_vmem [thread:$0]  %s3400_s0, 128, %s23_s11, [#allocation3]  }
  0x23   :  { %s3276_s17 = smov [#allocation7]  }
  0x24   :  { %s45_s18 = sshll.u32 %s3276_s17, 4  ;;  %s46_s18 = int_to_ptr.vmem [resolvable:$true] %s45_s18 }
  0x25   :  { %s3211_s19 = scalar_lea.vmem %s46_s18, 8192  ;;  %p3216_p2 = scmp.lt.s32.totalorder %s46_s18, %s46_s18 }
  0x26   :  { %p3212_p1 = scmp.ne.s32.totalorder %s46_s18, %s3211_s19  ;;  %p3217_p3 = scmp.lt.s32.totalorder %s3211_s19, %s3211_s19 }
  0x28   :  { %p3218_p4 = por %p3217_p3, %p3216_p2 }
  0x2a   :  { %p3219_p5 = pnand %p3218_p4, %p3212_p1 }
  0x2c   :  { %3222 = shalt.err (!%p3219_p5)
}
  0x2d   :  { %s3277_s4 = smov 256   ;;  %s3278_s20 = smov 16  }
  0x2e   :  { %51 = dma.hbm_to_vmem [thread:$0]  %s3403_s3, 8192, %s46_s18, [#allocation6], %s3277_s4, %s3277_s4, %s3278_s20  }
  0x2f   :  { %s3279_s23 = smov [#allocation10]  }
  0x30   :  { %s67_s24 = sshll.u32 %s3279_s23, 4  ;;  %s68_s24 = int_to_ptr.vmem [resolvable:$true] %s67_s24 }
  0x31   :  { %s3231_s0 = scalar_lea.vmem %s68_s24, 32768  ;;  %p3236_p7 = scmp.lt.s32.totalorder %s68_s24, %s68_s24 }
  0x32   :  { %p3232_p6 = scmp.ne.s32.totalorder %s68_s24, %s3231_s0  ;;  %p3237_p8 = scmp.lt.s32.totalorder %s3231_s0, %s3231_s0 }
  0x34   :  { %p3238_p9 = por %p3237_p8, %p3236_p7 }
  0x36   :  { %p3239_p10 = pnand %p3238_p9, %p3232_p6 }
  0x38   :  { %3242 = shalt.err (!%p3239_p10)
}
  0x39   :  { %s3280_s25 = smov 512   ;;  %s3281_s26 = smov 32  }
  0x3a   :  { %73 = dma.hbm_to_vmem [thread:$0]  %s3405_s5, 32768, %s68_s24, [#allocation9], %s3280_s25, %s3280_s25, %s3281_s26  }
  0x3b   :  { %3263 = dma.done.wait [#allocation3], 128  }
  0x3c   :  { %3264 = vsyncadd [#allocation3], 4294967168 }
  0x3d   :  { %3265 = dma.done.wait [#allocation6], 10240  }
  0x3e   :  { %3266 = vsyncadd [#allocation6], 4294957056 }
  0x3f   :  { %3267 = dma.done.wait [#allocation9], 32832  }
  0x40   :  { %3268 = vsyncadd [#allocation9], 4294934464  ;;  %v3282_v0 = vmov 0   ;;  %v3023_v1 = vld [vmem:[#allocation5 + $0x74] ss:$8 sps:$4 sm:$0xff]  }
  0x41   :  { %234 = vmatprep.mubr.bf16.mxu0 %v3282_v0  ;;  %v3025_v2 = vld [vmem:[#allocation5 + $0x70] ss:$8 sps:$4 sm:$0xff]   ;;  %202 = vmatprep.subr.bf16.mxu0 %v3023_v1  ;;  %v3026_v3 = vld [vmem:[#allocation5 + $0x64] ss:$8 sps:$4 sm:$0xff]   ;;  %v3028_v4 = vld [vmem:[#allocation5 + $0x60] ss:$8 sps:$4 sm:$0xff]  }
  0x42   :  { %203 = vmatpush1.bf16.msra.mxu0 %v3025_v2  ;;  %v3029_v5 = vld [vmem:[#allocation5 + $0x54] ss:$8 sps:$4 sm:$0xff]   ;;  %v3031_v6 = vld [vmem:[#allocation5 + $0x50] ss:$8 sps:$4 sm:$0xff]   ;;  %v3032_v7 = vld [vmem:[#allocation5 + $0x44] ss:$8 sps:$4 sm:$0xff]  }
  0x43   :  { %204 = vmatprep.subr.bf16.mxu0 %v3026_v3  ;;  %v3034_v8 = vld [vmem:[#allocation5 + $0x40] ss:$8 sps:$4 sm:$0xff]   ;;  %v3047_v9 = vld [vmem:[#allocation7 + $0xe4] ss:$16 sps:$4 sm:$0xff]   ;;  %v3037_v13 = vld [vmem:[#allocation5 + $0x30] ss:$8 sps:$4 sm:$0xff]  }
  0x44   :  { %v3035_v10 = vld [vmem:[#allocation5 + $0x34] ss:$8 sps:$4 sm:$0xff]   ;;  %653 = vmatprep.subr.bf16.mxu1 %v3047_v9  ;;  %v3052_v11 = vld [vmem:[#allocation7 + $0xe0] ss:$16 sps:$4 sm:$0xff]   ;;  %v3038_v14 = vld [vmem:[#allocation5 + $0x24] ss:$8 sps:$4 sm:$0xff]  }
  0x45   :  { %v3053_v12 = vld [vmem:[#allocation7 + $0xc4] ss:$16 sps:$4 sm:$0xff]   ;;  %654 = vmatpush1.bf16.msra.mxu1 %v3052_v11  ;;  %v3058_v15 = vld [vmem:[#allocation7 + $0xc0] ss:$16 sps:$4 sm:$0xff]   ;;  %v92_v26 = vld [vmem:[#allocation2] sm:$0xff] }
  0x46   :  { %205 = vmatpush1.bf16.msra.mxu0 %v3028_v4  ;;  %655 = vmatprep.subr.bf16.mxu1 %v3053_v12  ;;  %v3059_v16 = vld [vmem:[#allocation7 + $0xa4] ss:$16 sps:$4 sm:$0xff]   ;;  %v3040_v17 = vld [vmem:[#allocation5 + $0x20] ss:$8 sps:$4 sm:$0xff]   ;;  %v3043_v21 = vld [vmem:[#allocation5 + $0x10] ss:$8 sps:$4 sm:$0xff]   ;;  %v93_v30 = vpack.c.bf16 %v92_v26, %v92_v26 }
  0x47   :  { %206 = vmatprep.subr.bf16.mxu0 %v3029_v5  ;;  %v3041_v18 = vld [vmem:[#allocation5 + $0x14] ss:$8 sps:$4 sm:$0xff]   ;;  %v3064_v19 = vld [vmem:[#allocation7 + $0xa0] ss:$16 sps:$4 sm:$0xff]   ;;  %v3044_v22 = vld [vmem:[#allocation5 + $0x4] ss:$8 sps:$4 sm:$0xff]  }
  0x48   :  { %v3065_v20 = vld [vmem:[#allocation7 + $0x84] ss:$16 sps:$4 sm:$0xff]   ;;  %v3070_v23 = vld [vmem:[#allocation7 + $0x80] ss:$16 sps:$4 sm:$0xff]   ;;  %v3051_v27 = vld [vmem:[#allocation7 + $0xec] ss:$16 sps:$4 sm:$0xff]  }
  0x49   :  { %656 = vmatpush1.bf16.msra.mxu1 %v3058_v15  ;;  %v3071_v24 = vld [vmem:[#allocation7 + $0x64] ss:$16 sps:$4 sm:$0xff]   ;;  %v3046_v25 = vld [vmem:[#allocation5] ss:$8 sps:$4 sm:$0xff]   ;;  %v3057_v32 = vld [vmem:[#allocation7 + $0xcc] ss:$16 sps:$4 sm:$0xff]  }
  0x4a   :  { %207 = vmatpush1.bf16.msra.mxu0 %v3031_v6  ;;  %657 = vmatprep.subr.bf16.mxu1 %v3059_v16  ;;  %v3076_v28 = vld [vmem:[#allocation7 + $0x60] ss:$16 sps:$4 sm:$0xff]   ;;  %v3077_v29 = vld [vmem:[#allocation7 + $0x44] ss:$16 sps:$4 sm:$0xff]   ;;  %v3049_v31 = vld [vmem:[#allocation7 + $0xe8] ss:$16 sps:$4 sm:$0xff]  }
  0x4b   :  { %208 = vmatprep.subr.bf16.mxu0 %v3032_v7  ;;  %v3082_v33 = vld [vmem:[#allocation7 + $0x40] ss:$16 sps:$4 sm:$0xff]   ;;  %v3083_v34 = vld [vmem:[#allocation7 + $0x24] ss:$16 sps:$4 sm:$0xff]   ;;  %v3055_v35 = vld [vmem:[#allocation7 + $0xc8] ss:$16 sps:$4 sm:$0xff]  }
  0x4c   :  { %v3063_v36 = vld [vmem:[#allocation7 + $0xac] ss:$16 sps:$4 sm:$0xff]   ;;  %v3088_v37 = vld [vmem:[#allocation7 + $0x20] ss:$16 sps:$4 sm:$0xff]   ;;  %v3089_v38 = vld [vmem:[#allocation7 + $0x4] ss:$16 sps:$4 sm:$0xff]  }
  0x4d   :  { %658 = vmatpush1.bf16.msra.mxu1 %v3064_v19  ;;  %v3061_v39 = vld [vmem:[#allocation7 + $0xa8] ss:$16 sps:$4 sm:$0xff]   ;;  %v3069_v40 = vld [vmem:[#allocation7 + $0x8c] ss:$16 sps:$4 sm:$0xff]   ;;  %v3094_v41 = vld [vmem:[#allocation7] ss:$16 sps:$4 sm:$0xff]  }
  0x4e   :  { %209 = vmatpush1.bf16.msra.mxu0 %v3034_v8  ;;  %659 = vmatprep.subr.bf16.mxu1 %v3065_v20  ;;  %v3095_v42 = vld [vmem:[#allocation7 + $0x1e4] ss:$16 sps:$4 sm:$0xff]   ;;  %v3067_v43 = vld [vmem:[#allocation7 + $0x88] ss:$16 sps:$4 sm:$0xff]   ;;  %v3075_v44 = vld [vmem:[#allocation7 + $0x6c] ss:$16 sps:$4 sm:$0xff]  }
  0x4f   :  { %210 = vmatprep.subr.bf16.mxu0 %v3035_v10  ;;  %v3100_v45 = vld [vmem:[#allocation7 + $0x1e0] ss:$16 sps:$4 sm:$0xff]   ;;  %v3101_v46 = vld [vmem:[#allocation7 + $0x1c4] ss:$16 sps:$4 sm:$0xff]   ;;  %v3073_v47 = vld [vmem:[#allocation7 + $0x68] ss:$16 sps:$4 sm:$0xff]  }
  0x50   :  { %v3106_v48 = vld [vmem:[#allocation7 + $0x1c0] ss:$16 sps:$4 sm:$0xff]   ;;  %v3081_v49 = vld [vmem:[#allocation7 + $0x4c] ss:$16 sps:$4 sm:$0xff]   ;;  %v3107_v50 = vld [vmem:[#allocation7 + $0x1a4] ss:$16 sps:$4 sm:$0xff]  }
  0x51   :  { %660 = vmatpush1.bf16.msra.mxu1 %v3070_v23  ;;  %v3079_v51 = vld [vmem:[#allocation7 + $0x48] ss:$16 sps:$4 sm:$0xff]   ;;  %v3112_v52 = vld [vmem:[#allocation7 + $0x1a0] ss:$16 sps:$4 sm:$0xff]   ;;  %v3087_v53 = vld [vmem:[#allocation7 + $0x2c] ss:$16 sps:$4 sm:$0xff]  }
  0x52   :  { %211 = vmatpush1.bf16.msra.mxu0 %v3037_v13  ;;  %661 = vmatprep.subr.bf16.mxu1 %v3071_v24  ;;  %v3113_v54 = vld [vmem:[#allocation7 + $0x184] ss:$16 sps:$4 sm:$0xff]   ;;  %v3085_v55 = vld [vmem:[#allocation7 + $0x28] ss:$16 sps:$4 sm:$0xff]   ;;  %v3118_v56 = vld [vmem:[#allocation7 + $0x180] ss:$16 sps:$4 sm:$0xff]  }
  0x53   :  { %212 = vmatprep.subr.bf16.mxu0 %v3038_v14  ;;  %v3093_v57 = vld [vmem:[#allocation7 + $0xc] ss:$16 sps:$4 sm:$0xff]   ;;  %v3119_v58 = vld [vmem:[#allocation7 + $0x164] ss:$16 sps:$4 sm:$0xff]   ;;  %v3091_v59 = vld [vmem:[#allocation7 + $0x8] ss:$16 sps:$4 sm:$0xff]  }
  0x54   :  { %v3124_v60 = vld [vmem:[#allocation7 + $0x160] ss:$16 sps:$4 sm:$0xff]   ;;  %v3099_v61 = vld [vmem:[#allocation7 + $0x1ec] ss:$16 sps:$4 sm:$0xff]   ;;  %v3125_v62 = vld [vmem:[#allocation7 + $0x144] ss:$16 sps:$4 sm:$0xff]  }
  0x55   :  { %662 = vmatpush1.bf16.msra.mxu1 %v3076_v28  ;;  %v3097_v63 = vld [vmem:[#allocation7 + $0x1e8] ss:$16 sps:$4 sm:$0xff]   ;;  %v3130_v0 = vld [vmem:[#allocation7 + $0x140] ss:$16 sps:$4 sm:$0xff]   ;;  %v3105_v1 = vld [vmem:[#allocation7 + $0x1cc] ss:$16 sps:$4 sm:$0xff]  }
  0x56   :  { %213 = vmatpush1.bf16.msra.mxu0 %v3040_v17  ;;  %663 = vmatprep.subr.bf16.mxu1 %v3077_v29  ;;  %v3103_v2 = vld [vmem:[#allocation7 + $0x1c8] ss:$16 sps:$4 sm:$0xff]   ;;  %v3111_v3 = vld [vmem:[#allocation7 + $0x1ac] ss:$16 sps:$4 sm:$0xff]   ;;  %v3131_v11 = vld [vmem:[#allocation7 + $0x124] ss:$16 sps:$4 sm:$0xff]  }
  0x57   :  { %214 = vmatprep.subr.bf16.mxu0 %v3041_v18  ;;  %v3109_v4 = vld [vmem:[#allocation7 + $0x1a8] ss:$16 sps:$4 sm:$0xff]   ;;  %v3117_v5 = vld [vmem:[#allocation7 + $0x18c] ss:$16 sps:$4 sm:$0xff]   ;;  %v3136_v14 = vld [vmem:[#allocation7 + $0x120] ss:$16 sps:$4 sm:$0xff]  }
  0x58   :  { %v3115_v6 = vld [vmem:[#allocation7 + $0x188] ss:$16 sps:$4 sm:$0xff]   ;;  %v3123_v7 = vld [vmem:[#allocation7 + $0x16c] ss:$16 sps:$4 sm:$0xff]   ;;  %v3137_v15 = vld [vmem:[#allocation7 + $0x104] ss:$16 sps:$4 sm:$0xff]  }
  0x59   :  { %664 = vmatpush1.bf16.msra.mxu1 %v3082_v33  ;;  %v3121_v8 = vld [vmem:[#allocation7 + $0x168] ss:$16 sps:$4 sm:$0xff]   ;;  %v3129_v9 = vld [vmem:[#allocation7 + $0x14c] ss:$16 sps:$4 sm:$0xff]   ;;  %v3142_v18 = vld [vmem:[#allocation7 + $0x100] ss:$16 sps:$4 sm:$0xff]  }
  0x5a   :  { %215 = vmatpush1.bf16.msra.mxu0 %v3043_v21  ;;  %665 = vmatprep.subr.bf16.mxu1 %v3083_v34  ;;  %v3127_v10 = vld [vmem:[#allocation7 + $0x148] ss:$16 sps:$4 sm:$0xff]   ;;  %v3135_v12 = vld [vmem:[#allocation7 + $0x12c] ss:$16 sps:$4 sm:$0xff]  }
  0x5b   :  { %216 = vmatprep.subr.bf16.mxu0 %v3044_v22  ;;  %v3133_v13 = vld [vmem:[#allocation7 + $0x128] ss:$16 sps:$4 sm:$0xff]   ;;  %v3141_v16 = vld [vmem:[#allocation7 + $0x10c] ss:$16 sps:$4 sm:$0xff]  }
  0x5c   :  { %v3139_v17 = vld [vmem:[#allocation7 + $0x108] ss:$16 sps:$4 sm:$0xff]  }
  0x5d   :  { %666 = vmatpush1.bf16.msra.mxu1 %v3088_v37  ;;  %v799_v19 = vld [vmem:[#allocation10 + $0x1c0] sm:$0xff] }
  0x5e   :  { %217 = vmatpush1.bf16.msra.mxu0 %v3046_v25  ;;  %667 = vmatprep.subr.bf16.mxu1 %v3089_v38  ;;  %v803_v20 = vld [vmem:[#allocation10 + $0x1e0] sm:$0xff] }
  0x5f   :  { %694 = vmatprep.subr.bf16.mxu0 %v3051_v27  ;;  %v927_v21 = vld [vmem:[#allocation10 + $0x5c0] sm:$0xff]  ;;  %v2810_v22 = vcombine.low %v799_v19, %v803_v20  ;;  %v2811_v23 = vcombine.high %v799_v19, %v803_v20  ;;  %v112_v27 = vlaneseq }
  0x60   :  { %v931_v24 = vld [vmem:[#allocation10 + $0x5e0] sm:$0xff] }
  0x61   :  { %235 = vmatmul.mubr.bf16.vlgmr.msra.gmra.mxu0 %v93_v30  ;;  %668 = vmatpush1.bf16.msra.mxu1 %v3094_v41  ;;  %v2938_v25 = vcombine.low %v927_v21, %v931_v24  ;;  %v2939_v26 = vcombine.high %v927_v21, %v931_v24  ;;  %v3339_v28 = vshrl.u32 %v112_v27, 7  ;;  %v110_v30 = vld [vmem:[%s3402_s2] sm:$0x3]  ;;  %v755_v19 = vld [vmem:[#allocation10 + $0x60] sm:$0xff] }
  0x62   :  { %695 = vmatpush1.bf16.msra.mxu0 %v3049_v31  ;;  %669 = vmatprep.subr.bf16.mxu1 %v3095_v42  ;;  %v795_v42 = vld [vmem:[#allocation10 + $0x1a0] sm:$0xff] }
  0x63   :  { %696 = vmatprep.subr.bf16.mxu0 %v3057_v32  ;;  %v3342_v29 = vsub.s32 0, %v3339_v28  ;;  %v3348_v31 = vsub.s32 1, %v3339_v28  ;;  %v879_v20 = vld [vmem:[#allocation10 + $0x440] sm:$0xff] }
  0x64   :  { %v883_v21 = vld [vmem:[#allocation10 + $0x460] sm:$0xff] }
  0x65   :  { %670 = vmatpush2.bf16.msra.mxu1 %v3100_v45  ;;  %v115_v32 = vrot.slane %v110_v30, %v3342_v29  ;;  %v119_v33 = vrot.slane %v110_v30, %v3348_v31  ;;  %v747_v27 = vld [vmem:[#allocation10 + $0x20] sm:$0xff] }
  0x66   :  { %697 = vmatpush1.bf16.msra.mxu0 %v3055_v35  ;;  %671 = vmatprep.subr.bf16.mxu1 %v3101_v46  ;;  %v871_v30 = vld [vmem:[#allocation10 + $0x400] sm:$0xff] }
  0x67   :  { %698 = vmatprep.subr.bf16.mxu0 %v3063_v36 }
  0x69   :  { %672 = vmatpush2.bf16.msra.mxu1 %v3106_v48 }
  0x6a   :  { %699 = vmatpush1.bf16.msra.mxu0 %v3061_v39  ;;  %673 = vmatprep.subr.bf16.mxu1 %v3107_v50  ;;  %v783_v50 = vld [vmem:[#allocation10 + $0x140] sm:$0xff] }
  0x6b   :  { %700 = vmatprep.subr.bf16.mxu0 %v3069_v40  ;;  %v791_v40 = vld [vmem:[#allocation10 + $0x180] sm:$0xff] }
  0x6c   :  { %v2803_v48 = vcombine.high %v791_v40, %v795_v42 }
  0x6d   :  { %674 = vmatpush2.bf16.msra.mxu1 %v3112_v52  ;;  %v911_v52 = vld [vmem:[#allocation10 + $0x540] sm:$0xff] }
  0x6e   :  { %701 = vmatpush1.bf16.msra.mxu0 %v3067_v43  ;;  %675 = vmatprep.subr.bf16.mxu1 %v3113_v54  ;;  %v919_v43 = vld [vmem:[#allocation10 + $0x580] sm:$0xff]  ;;  %v2802_v54 = vcombine.low %v791_v40, %v795_v42 }
  0x6f   :  { %702 = vmatprep.subr.bf16.mxu0 %v3075_v44  ;;  %v923_v44 = vld [vmem:[#allocation10 + $0x5a0] sm:$0xff] }
  0x70   :  { %v995_v40 = vld [vmem:[#allocation10 + $0x7e0] sm:$0xff] }
  0x71   :  { %676 = vmatpush2.bf16.msra.mxu1 %v3118_v56 }
  0x72   :  { %703 = vmatpush1.bf16.msra.mxu0 %v3073_v47  ;;  %677 = vmatprep.subr.bf16.mxu1 %v3119_v58  ;;  %v775_v58 = vld [vmem:[#allocation10 + $0x100] sm:$0xff] }
  0x73   :  { %704 = vmatprep.subr.bf16.mxu0 %v3081_v49  ;;  %v2931_v49 = vcombine.high %v919_v43, %v923_v44 }
  0x75   :  { %678 = vmatpush2.bf16.msra.mxu1 %v3124_v60  ;;  %v903_v60 = vld [vmem:[#allocation10 + $0x500] sm:$0xff] }
  0x76   :  { %705 = vmatpush1.bf16.msra.mxu0 %v3079_v51  ;;  %679 = vmatprep.subr.bf16.mxu1 %v3125_v62  ;;  %v787_v51 = vld [vmem:[#allocation10 + $0x160] sm:$0xff] }
  0x77   :  { %706 = vmatprep.subr.bf16.mxu0 %v3087_v53  ;;  %v915_v53 = vld [vmem:[#allocation10 + $0x560] sm:$0xff]  ;;  %v2795_v56 = vcombine.high %v783_v50, %v787_v51  ;;  %v2794_v62 = vcombine.low %v783_v50, %v787_v51 }
  0x79   :  { %680 = vmatpush2.bf16.msra.mxu1 %v3130_v0 }
  0x7a   :  { %707 = vmatpush1.bf16.msra.mxu0 %v3085_v55  ;;  %681 = vmatprep.subr.bf16.mxu1 %v3131_v11  ;;  %v2930_v55 = vcombine.low %v919_v43, %v923_v44  ;;  %v763_v11 = vld [vmem:[#allocation10 + $0xa0] sm:$0xff] }
  0x7b   :  { %708 = vmatprep.subr.bf16.mxu0 %v3093_v57  ;;  %v2923_v57 = vcombine.high %v911_v52, %v915_v53 }
  0x7d   :  { %682 = vmatpush2.bf16.msra.mxu1 %v3136_v14 }
  0x7e   :  { %709 = vmatpush1.bf16.msra.mxu0 %v3091_v59  ;;  %683 = vmatprep.subr.bf16.mxu1 %v3137_v15  ;;  %v779_v59 = vld [vmem:[#allocation10 + $0x120] sm:$0xff] }
  0x7f   :  { %710 = vmatprep.subr.bf16.mxu0 %v3099_v61  ;;  %v907_v61 = vld [vmem:[#allocation10 + $0x520] sm:$0xff]  ;;  %v2787_v0 = vcombine.high %v775_v58, %v779_v59 }
  0x81   :  { %684 = vmatpush2.bf16.msra.mxu1 %v3142_v18  ;;  %v751_v18 = vld [vmem:[#allocation10 + $0x40] sm:$0xff] }
  0x82   :  { %711 = vmatpush2.bf16.msra.mxu0 %v3097_v63  ;;  %2321 = vmatprep.subr.bf16.mxu1 %v2811_v23  ;;  %v2922_v63 = vcombine.low %v911_v52, %v915_v53  ;;  %v2763_v24 = vcombine.high %v751_v18, %v755_v19  ;;  %v847_v53 = vld [vmem:[#allocation10 + $0x340] sm:$0xff] }
  0x83   :  { %712 = vmatprep.subr.bf16.mxu0 %v3105_v1  ;;  %v2915_v1 = vcombine.high %v903_v60, %v907_v61 }
  0x86   :  { %713 = vmatpush2.bf16.msra.mxu0 %v3103_v2  ;;  %v767_v2 = vld [vmem:[#allocation10 + $0xc0] sm:$0xff] }
  0x87   :  { %714 = vmatprep.subr.bf16.mxu0 %v3111_v3  ;;  %v771_v3 = vld [vmem:[#allocation10 + $0xe0] sm:$0xff] }
  0x88   :  { %v2778_v14 = vcombine.low %v767_v2, %v771_v3 }
  0x8a   :  { %715 = vmatpush2.bf16.msra.mxu0 %v3109_v4  ;;  %v895_v4 = vld [vmem:[#allocation10 + $0x4c0] sm:$0xff] }
  0x8b   :  { %716 = vmatprep.subr.bf16.mxu0 %v3117_v5  ;;  %v899_v5 = vld [vmem:[#allocation10 + $0x4e0] sm:$0xff] }
  0x8c   :  { %v2906_v15 = vcombine.low %v895_v4, %v899_v5 }
  0x8e   :  { %717 = vmatpush2.bf16.msra.mxu0 %v3115_v6  ;;  %v2786_v6 = vcombine.low %v775_v58, %v779_v59 }
  0x8f   :  { %718 = vmatprep.subr.bf16.mxu0 %v3123_v7  ;;  %v2914_v7 = vcombine.low %v903_v60, %v907_v61  ;;  %v839_v61 = vld [vmem:[#allocation10 + $0x300] sm:$0xff] }
  0x92   :  { %719 = vmatpush2.bf16.msra.mxu0 %v3121_v8  ;;  %v2779_v8 = vcombine.high %v767_v2, %v771_v3 }
  0x93   :  { %720 = vmatprep.subr.bf16.mxu0 %v3129_v9  ;;  %v2907_v9 = vcombine.high %v895_v4, %v899_v5  ;;  %v831_v5 = vld [vmem:[#allocation10 + $0x2c0] sm:$0xff] }
  0x96   :  { %721 = vmatpush2.bf16.msra.mxu0 %v3127_v10  ;;  %v759_v10 = vld [vmem:[#allocation10 + $0x80] sm:$0xff] }
  0x97   :  { %722 = vmatprep.subr.bf16.mxu0 %v3135_v12  ;;  %v887_v12 = vld [vmem:[#allocation10 + $0x480] sm:$0xff] }
  0x9a   :  { %723 = vmatpush2.bf16.msra.mxu0 %v3133_v13  ;;  %v891_v13 = vld [vmem:[#allocation10 + $0x4a0] sm:$0xff] }
  0x9b   :  { %724 = vmatprep.subr.bf16.mxu0 %v3141_v16  ;;  %v2771_v16 = vcombine.high %v759_v10, %v763_v11  ;;  %v2898_v23 = vcombine.low %v887_v12, %v891_v13 }
  0x9e   :  { %725 = vmatpush2.bf16.msra.mxu0 %v3139_v17  ;;  %v2899_v17 = vcombine.high %v887_v12, %v891_v13  ;;  %v823_v13 = vld [vmem:[#allocation10 + $0x280] sm:$0xff] }
  0x9f   :  { %2362 = vmatprep.subr.bf16.mxu0 %v2939_v26  ;;  %v743_v26 = vld [vmem:[#allocation10] sm:$0xff] }
 0x121   :  { %v236_v34 = vpop.f32.mrf.mxu0 }
 0x122   :  { %v237_v35 = vadd.f32 %v236_v34, %v115_v32  ;;  %v875_v32 = vld [vmem:[#allocation10 + $0x420] sm:$0xff]  ;;  %v2890_v34 = vcombine.low %v879_v20, %v883_v21 }
 0x123   :  { %v238_v36 = vpop.f32.mrf.mxu0  ;;  %v2882_v42 = vcombine.low %v871_v30, %v875_v32 }
 0x124   :  { %v239_v37 = vadd.f32 %v238_v36, %v119_v33  ;;  %v243_v38 = vmax.f32 %v237_v35, 0.0  ;;  %v2762_v33 = vcombine.low %v751_v18, %v755_v19  ;;  %v2755_v35 = vcombine.high %v743_v26, %v747_v27 }
 0x125   :  { %v240_v39 = vpop.f32.mrf.mxu0  ;;  %v2883_v36 = vcombine.high %v871_v30, %v875_v32 }
 0x126   :  { %v244_v41 = vmax.f32 %v239_v37, 0.0  ;;  %v245_v47 = vpack.c.bf16 %v243_v38, %v243_v38  ;;  %v863_v37 = vld [vmem:[#allocation10 + $0x3c0] sm:$0xff] }
 0x127   :  { %v241_v45 = vpop.f32.mrf.mxu0  ;;  %v867_v38 = vld [vmem:[#allocation10 + $0x3e0] sm:$0xff] }
 0x128   :  { %v246_v46 = vpack.c.bf16 %v244_v41, %v244_v41  ;;  %v991_v39 = vld [vmem:[#allocation10 + $0x7c0] sm:$0xff]  ;;  %v2754_v41 = vcombine.low %v743_v26, %v747_v27  ;;  %v2875_v43 = vcombine.high %v863_v37, %v867_v38 }
 0x129   :  { %v3003_v44 = vcombine.high %v991_v39, %v995_v40  ;;  %v855_v45 = vld [vmem:[#allocation10 + $0x380] sm:$0xff]  ;;  %v3002_v50 = vcombine.low %v991_v39, %v995_v40 }
 0x12a   :  { %685 = vmatprep.mubr.bf16.mxu1 %v246_v46  ;;  %726 = vmatprep.mubr.bf16.mxu0 %v246_v46  ;;  %v859_v46 = vld [vmem:[#allocation10 + $0x3a0] sm:$0xff] }
 0x12b   :  { %686 = vmatmul.mubr.bf16.vlgmr.msra.gmra.mxu1 %v245_v47  ;;  %727 = vmatmul.mubr.bf16.vlgmr.msra.gmra.mxu0 %v245_v47  ;;  %v983_v47 = vld [vmem:[#allocation10 + $0x780] sm:$0xff]  ;;  %v2867_v51 = vcombine.high %v855_v45, %v859_v46 }
 0x12c   :  { %2322 = vmatpush1.bf16.msra.mxu1 %v2810_v22  ;;  %2363 = vmatpush1.bf16.msra.mxu0 %v2938_v25  ;;  %v2770_v22 = vcombine.low %v759_v10, %v763_v11  ;;  %v2891_v25 = vcombine.high %v879_v20, %v883_v21  ;;  %v947_v27 = vld [vmem:[#allocation10 + $0x660] sm:$0xff] }
 0x12d   :  { %2323 = vmatprep.subr.bf16.mxu1 %v2803_v48  ;;  %2364 = vmatprep.subr.bf16.mxu0 %v2931_v49  ;;  %v987_v48 = vld [vmem:[#allocation10 + $0x7a0] sm:$0xff]  ;;  %v2874_v49 = vcombine.low %v863_v37, %v867_v38 }
 0x12e   :  { %v2995_v52 = vcombine.high %v983_v47, %v987_v48  ;;  %v2994_v58 = vcombine.low %v983_v47, %v987_v48  ;;  %v939_v38 = vld [vmem:[#allocation10 + $0x620] sm:$0xff] }
 0x130   :  { %2324 = vmatpush1.bf16.msra.mxu1 %v2802_v54  ;;  %2365 = vmatpush1.bf16.msra.mxu0 %v2930_v55  ;;  %v851_v54 = vld [vmem:[#allocation10 + $0x360] sm:$0xff] }
 0x131   :  { %2325 = vmatprep.subr.bf16.mxu1 %v2795_v56  ;;  %2366 = vmatprep.subr.bf16.mxu0 %v2923_v57  ;;  %v975_v55 = vld [vmem:[#allocation10 + $0x740] sm:$0xff]  ;;  %v2866_v57 = vcombine.low %v855_v45, %v859_v46  ;;  %v2859_v59 = vcombine.high %v847_v53, %v851_v54  ;;  %v932_v46 = vld [vmem:[#allocation10 + $0x5e8] sm:$0xff] }
 0x132   :  { %v979_v56 = vld [vmem:[#allocation10 + $0x760] sm:$0xff] }
 0x133   :  { %v2987_v60 = vcombine.high %v975_v55, %v979_v56  ;;  %v2986_v2 = vcombine.low %v975_v55, %v979_v56 }
 0x134   :  { %2326 = vmatpush1.bf16.msra.mxu1 %v2794_v62  ;;  %2367 = vmatpush1.bf16.msra.mxu0 %v2922_v63  ;;  %v843_v62 = vld [vmem:[#allocation10 + $0x320] sm:$0xff] }
 0x135   :  { %2327 = vmatprep.subr.bf16.mxu1 %v2787_v0  ;;  %2368 = vmatprep.subr.bf16.mxu0 %v2915_v1  ;;  %v967_v63 = vld [vmem:[#allocation10 + $0x700] sm:$0xff]  ;;  %v2858_v1 = vcombine.low %v847_v53, %v851_v54  ;;  %v2851_v3 = vcombine.high %v839_v61, %v843_v62 }
 0x136   :  { %v971_v0 = vld [vmem:[#allocation10 + $0x720] sm:$0xff] }
 0x137   :  { %v2979_v4 = vcombine.high %v967_v63, %v971_v0  ;;  %v2978_v10 = vcombine.low %v967_v63, %v971_v0 }
 0x138   :  { %2328 = vmatpush1.bf16.msra.mxu1 %v2786_v6  ;;  %2369 = vmatpush1.bf16.msra.mxu0 %v2914_v7  ;;  %v835_v6 = vld [vmem:[#allocation10 + $0x2e0] sm:$0xff] }
 0x139   :  { %2329 = vmatprep.subr.bf16.mxu1 %v2779_v8  ;;  %2370 = vmatprep.subr.bf16.mxu0 %v2907_v9  ;;  %v959_v7 = vld [vmem:[#allocation10 + $0x6c0] sm:$0xff]  ;;  %v2850_v9 = vcombine.low %v839_v61, %v843_v62  ;;  %v2843_v11 = vcombine.high %v831_v5, %v835_v6 }
 0x13a   :  { %v963_v8 = vld [vmem:[#allocation10 + $0x6e0] sm:$0xff] }
 0x13b   :  { %v2971_v12 = vcombine.high %v959_v7, %v963_v8  ;;  %v2970_v18 = vcombine.low %v959_v7, %v963_v8  ;;  %v792_v7 = vld [vmem:[#allocation10 + $0x188] sm:$0xff] }
 0x13c   :  { %2330 = vmatpush1.bf16.msra.mxu1 %v2778_v14  ;;  %2371 = vmatpush1.bf16.msra.mxu0 %v2906_v15  ;;  %v827_v14 = vld [vmem:[#allocation10 + $0x2a0] sm:$0xff] }
 0x13d   :  { %2331 = vmatprep.subr.bf16.mxu1 %v2771_v16  ;;  %2372 = vmatprep.subr.bf16.mxu0 %v2899_v17  ;;  %v951_v15 = vld [vmem:[#allocation10 + $0x680] sm:$0xff]  ;;  %v2842_v17 = vcombine.low %v831_v5, %v835_v6  ;;  %v2835_v19 = vcombine.high %v823_v13, %v827_v14  ;;  %v2834_v21 = vcombine.low %v823_v13, %v827_v14 }
 0x13e   :  { %v955_v16 = vld [vmem:[#allocation10 + $0x6a0] sm:$0xff] }
 0x13f   :  { %v2963_v20 = vcombine.high %v951_v15, %v955_v16 }
 0x140   :  { %2332 = vmatpush1.bf16.msra.mxu1 %v2770_v22  ;;  %2373 = vmatpush1.bf16.msra.mxu0 %v2898_v23  ;;  %v2962_v22 = vcombine.low %v951_v15, %v955_v16  ;;  %v815_v23 = vld [vmem:[#allocation10 + $0x240] sm:$0xff] }
 0x141   :  { %2333 = vmatprep.subr.bf16.mxu1 %v2763_v24  ;;  %2374 = vmatprep.subr.bf16.mxu0 %v2891_v25  ;;  %v819_v24 = vld [vmem:[#allocation10 + $0x260] sm:$0xff] }
 0x142   :  { %v943_v25 = vld [vmem:[#allocation10 + $0x640] sm:$0xff]  ;;  %v2827_v26 = vcombine.high %v815_v23, %v819_v24  ;;  %v2826_v30 = vcombine.low %v815_v23, %v819_v24 }
 0x143   :  { %v2954_v32 = vcombine.low %v943_v25, %v947_v27 }
 0x144   :  { %2334 = vmatpush1.bf16.msra.mxu1 %v2762_v33  ;;  %2375 = vmatpush1.bf16.msra.mxu0 %v2890_v34  ;;  %v2955_v33 = vcombine.high %v943_v25, %v947_v27  ;;  %v807_v34 = vld [vmem:[#allocation10 + $0x200] sm:$0xff]  ;;  %v776_v27 = vld [vmem:[#allocation10 + $0x108] sm:$0xff] }
 0x145   :  { %2335 = vmatprep.subr.bf16.mxu1 %v2755_v35  ;;  %2376 = vmatprep.subr.bf16.mxu0 %v2883_v36  ;;  %v811_v35 = vld [vmem:[#allocation10 + $0x220] sm:$0xff] }
 0x146   :  { %v935_v36 = vld [vmem:[#allocation10 + $0x600] sm:$0xff]  ;;  %v2819_v37 = vcombine.high %v807_v34, %v811_v35  ;;  %v2818_v39 = vcombine.low %v807_v34, %v811_v35 }
 0x147   :  { %v2946_v40 = vcombine.low %v935_v36, %v939_v38 }
 0x148   :  { %2336 = vmatpush1.bf16.msra.mxu1 %v2754_v41  ;;  %2377 = vmatpush1.bf16.msra.mxu0 %v2882_v42  ;;  %v2947_v41 = vcombine.high %v935_v36, %v939_v38  ;;  %v800_v42 = vld [vmem:[#allocation10 + $0x1c8] sm:$0xff] }
 0x149   :  { %2337 = vmatprep.subr.bf16.mxu1 %v2875_v43  ;;  %2378 = vmatprep.subr.bf16.mxu0 %v3003_v44  ;;  %v804_v43 = vld [vmem:[#allocation10 + $0x1e8] sm:$0xff] }
 0x14a   :  { %v928_v44 = vld [vmem:[#allocation10 + $0x5c8] sm:$0xff]  ;;  %v2813_v45 = vcombine.high %v800_v42, %v804_v43  ;;  %v2812_v47 = vcombine.low %v800_v42, %v804_v43 }
 0x14b   :  { %v2940_v48 = vcombine.low %v928_v44, %v932_v46  ;;  %v768_v38 = vld [vmem:[#allocation10 + $0xc8] sm:$0xff] }
 0x14c   :  { %2338 = vmatpush2.bf16.msra.mxu1 %v2874_v49  ;;  %2379 = vmatpush2.bf16.msra.mxu0 %v3002_v50  ;;  %v2941_v49 = vcombine.high %v928_v44, %v932_v46  ;;  %v323_v50 = vsub.s32 2, %v3339_v28  ;;  %v760_v46 = vld [vmem:[#allocation10 + $0x88] sm:$0xff] }
 0x14d   :  { %2339 = vmatprep.subr.bf16.mxu1 %v2867_v51  ;;  %2380 = vmatprep.subr.bf16.mxu0 %v2995_v52  ;;  %v311_v51 = vld [vmem:[#allocation8] sm:$0xf]  ;;  %v327_v52 = vsub.s32 3, %v3339_v28 }
 0x14e   :  { %v316_v53 = vrot.slane %v311_v51, %v3342_v29  ;;  %v324_v54 = vrot.slane %v311_v51, %v323_v50  ;;  %v320_v55 = vrot.slane %v311_v51, %v3348_v31 }
 0x14f   :  { %v328_v56 = vrot.slane %v311_v51, %v327_v52 }
 0x150   :  { %2340 = vmatpush2.bf16.msra.mxu1 %v2866_v57  ;;  %2381 = vmatpush2.bf16.msra.mxu0 %v2994_v58 }
 0x151   :  { %2341 = vmatprep.subr.bf16.mxu1 %v2859_v59  ;;  %2382 = vmatprep.subr.bf16.mxu0 %v2987_v60 }
 0x154   :  { %2342 = vmatpush2.bf16.msra.mxu1 %v2858_v1  ;;  %2383 = vmatpush2.bf16.msra.mxu0 %v2986_v2 }
 0x155   :  { %2343 = vmatprep.subr.bf16.mxu1 %v2851_v3  ;;  %2384 = vmatprep.subr.bf16.mxu0 %v2979_v4 }
 0x158   :  { %2344 = vmatpush2.bf16.msra.mxu1 %v2850_v9  ;;  %2385 = vmatpush2.bf16.msra.mxu0 %v2978_v10  ;;  %v796_v10 = vld [vmem:[#allocation10 + $0x1a8] sm:$0xff] }
 0x159   :  { %2345 = vmatprep.subr.bf16.mxu1 %v2843_v11  ;;  %2386 = vmatprep.subr.bf16.mxu0 %v2971_v12  ;;  %v920_v11 = vld [vmem:[#allocation10 + $0x588] sm:$0xff]  ;;  %v2804_v23 = vcombine.low %v792_v7, %v796_v10 }
 0x15a   :  { %v924_v12 = vld [vmem:[#allocation10 + $0x5a8] sm:$0xff] }
 0x15b   :  { %v2932_v24 = vcombine.low %v920_v11, %v924_v12 }
 0x15c   :  { %2346 = vmatpush2.bf16.msra.mxu1 %v2842_v17  ;;  %2387 = vmatpush2.bf16.msra.mxu0 %v2970_v18  ;;  %v784_v17 = vld [vmem:[#allocation10 + $0x148] sm:$0xff]  ;;  %v2805_v18 = vcombine.high %v792_v7, %v796_v10 }
 0x15d   :  { %2347 = vmatprep.subr.bf16.mxu1 %v2835_v19  ;;  %2388 = vmatprep.subr.bf16.mxu0 %v2963_v20  ;;  %v2933_v19 = vcombine.high %v920_v11, %v924_v12  ;;  %v788_v20 = vld [vmem:[#allocation10 + $0x168] sm:$0xff] }
 0x15e   :  { %v2797_v25 = vcombine.high %v784_v17, %v788_v20  ;;  %v2796_v34 = vcombine.low %v784_v17, %v788_v20  ;;  %v992_v10 = vld [vmem:[#allocation10 + $0x7c8] sm:$0xff] }
 0x15f   :  { %v996_v11 = vld [vmem:[#allocation10 + $0x7e8] sm:$0xff] }
 0x160   :  { %2348 = vmatpush2.bf16.msra.mxu1 %v2834_v21  ;;  %2389 = vmatpush2.bf16.msra.mxu0 %v2962_v22  ;;  %v912_v21 = vld [vmem:[#allocation10 + $0x548] sm:$0xff] }
 0x161   :  { %2349 = vmatprep.subr.bf16.mxu1 %v2827_v26  ;;  %2390 = vmatprep.subr.bf16.mxu0 %v2955_v33  ;;  %v916_v22 = vld [vmem:[#allocation10 + $0x568] sm:$0xff] }
 0x162   :  { %v2925_v26 = vcombine.high %v912_v21, %v916_v22  ;;  %v908_v33 = vld [vmem:[#allocation10 + $0x528] sm:$0xff]  ;;  %v2924_v35 = vcombine.low %v912_v21, %v916_v22 }
 0x163   :  { %v856_v20 = vld [vmem:[#allocation10 + $0x388] sm:$0xff] }
 0x164   :  { %2350 = vmatpush2.bf16.msra.mxu1 %v2826_v30  ;;  %2391 = vmatpush2.bf16.msra.mxu0 %v2954_v32  ;;  %v780_v30 = vld [vmem:[#allocation10 + $0x128] sm:$0xff] }
 0x165   :  { %2351 = vmatprep.subr.bf16.mxu1 %v2819_v37  ;;  %2392 = vmatprep.subr.bf16.mxu0 %v2947_v41  ;;  %v904_v32 = vld [vmem:[#allocation10 + $0x508] sm:$0xff]  ;;  %v2789_v36 = vcombine.high %v776_v27, %v780_v30  ;;  %v2788_v42 = vcombine.low %v776_v27, %v780_v30 }
 0x166   :  { %v2917_v37 = vcombine.high %v904_v32, %v908_v33  ;;  %v900_v41 = vld [vmem:[#allocation10 + $0x4e8] sm:$0xff]  ;;  %v2916_v43 = vcombine.low %v904_v32, %v908_v33 }
 0x167   :  { %v860_v21 = vld [vmem:[#allocation10 + $0x3a8] sm:$0xff] }
 0x168   :  { %2352 = vmatpush2.bf16.msra.mxu1 %v2818_v39  ;;  %2393 = vmatpush2.bf16.msra.mxu0 %v2946_v40  ;;  %v772_v39 = vld [vmem:[#allocation10 + $0xe8] sm:$0xff] }
 0x169   :  { %2403 = vmatprep.subr.bf16.mxu1 %v2813_v45  ;;  %2444 = vmatprep.subr.bf16.mxu0 %v2941_v49  ;;  %v896_v40 = vld [vmem:[#allocation10 + $0x4c8] sm:$0xff]  ;;  %v2781_v44 = vcombine.high %v768_v38, %v772_v39  ;;  %v2780_v51 = vcombine.low %v768_v38, %v772_v39 }
 0x16a   :  { %v2909_v45 = vcombine.high %v896_v40, %v900_v41  ;;  %v892_v49 = vld [vmem:[#allocation10 + $0x4a8] sm:$0xff] }
 0x16b   :  { %v984_v22 = vld [vmem:[#allocation10 + $0x788] sm:$0xff] }
 0x16c   :  { %v848_v30 = vld [vmem:[#allocation10 + $0x348] sm:$0xff] }
 0x16d   :  { %v852_v32 = vld [vmem:[#allocation10 + $0x368] sm:$0xff] }
 0x16e   :  { %v976_v33 = vld [vmem:[#allocation10 + $0x748] sm:$0xff] }
 0x16f   :  { %v840_v39 = vld [vmem:[#allocation10 + $0x308] sm:$0xff] }
 0x1eb   :  { %v687_v57 = vpop.f32.mrf.mxu1  ;;  %v728_v58 = vpop.f32.mrf.mxu0 }
 0x1ec   :  { %v688_v59 = vadd.f32 %v687_v57, %v316_v53  ;;  %v729_v60 = vadd.f32 %v728_v58, %v324_v54  ;;  %v2908_v53 = vcombine.low %v896_v40, %v900_v41  ;;  %v756_v57 = vld [vmem:[#allocation10 + $0x68] sm:$0xff] }
 0x1ed   :  { %v689_v61 = vpop.f32.mrf.mxu1  ;;  %v730_v62 = vpop.f32.mrf.mxu0  ;;  %v880_v58 = vld [vmem:[#allocation10 + $0x448] sm:$0xff] }
 0x1ee   :  { %v690_v63 = vadd.f32 %v689_v61, %v320_v55  ;;  %v731_v0 = vadd.f32 %v730_v62, %v328_v56  ;;  %v735_v1 = vmax.f32 %v688_v59, 0.0  ;;  %v737_v2 = vmax.f32 %v729_v60, 0.0  ;;  %v752_v56 = vld [vmem:[#allocation10 + $0x48] sm:$0xff] }
 0x1ef   :  { %v691_v3 = vpop.f32.mrf.mxu1  ;;  %v732_v4 = vpop.f32.mrf.mxu0  ;;  %v884_v59 = vld [vmem:[#allocation10 + $0x468] sm:$0xff]  ;;  %v2765_v62 = vcombine.high %v752_v56, %v756_v57 }
 0x1f0   :  { %v736_v5 = vmax.f32 %v690_v63, 0.0  ;;  %v738_v6 = vmax.f32 %v731_v0, 0.0  ;;  %v3364_v15 = vpack.c.bf16 %v735_v1, %v735_v1  ;;  %v3366_v16 = vpack.c.bf16 %v737_v2, %v737_v2  ;;  %v744_v0 = vld [vmem:[#allocation10 + $0x8] sm:$0xff] }
 0x1f1   :  { %v692_v8 = vpop.f32.mrf.mxu1  ;;  %v733_v9 = vpop.f32.mrf.mxu0  ;;  %v2893_v63 = vcombine.high %v880_v58, %v884_v59  ;;  %v748_v1 = vld [vmem:[#allocation10 + $0x28] sm:$0xff]  ;;  %v2764_v4 = vcombine.low %v752_v56, %v756_v57 }
 0x1f2   :  { %v3360_v13 = vpack.c.bf16 %v736_v5, %v736_v5  ;;  %v3362_v14 = vpack.c.bf16 %v738_v6, %v738_v6  ;;  %v872_v2 = vld [vmem:[#allocation10 + $0x408] sm:$0xff]  ;;  %v2892_v5 = vcombine.low %v880_v58, %v884_v59  ;;  %v2757_v6 = vcombine.high %v744_v0, %v748_v1 }
 0x1f3   :  { %v876_v3 = vld [vmem:[#allocation10 + $0x428] sm:$0xff]  ;;  %v2756_v12 = vcombine.low %v744_v0, %v748_v1 }
 0x1f4   :  { %2353 = vmatprep.mubr.bf16.mxu1 %v3360_v13  ;;  %2394 = vmatprep.mubr.bf16.mxu0 %v3362_v14  ;;  %v2885_v7 = vcombine.high %v872_v2, %v876_v3  ;;  %v864_v8 = vld [vmem:[#allocation10 + $0x3c8] sm:$0xff]  ;;  %v2884_v17 = vcombine.low %v872_v2, %v876_v3 }
 0x1f5   :  { %2354 = vmatmul.mubr.bf16.vlgmr.msra.gmra.mxu1 %v3364_v15  ;;  %2395 = vmatmul.mubr.bf16.vlgmr.msra.gmra.mxu0 %v3366_v16  ;;  %v868_v9 = vld [vmem:[#allocation10 + $0x3e8] sm:$0xff] }
 0x1f6   :  { %2404 = vmatpush1.bf16.msra.mxu1 %v2812_v47  ;;  %2445 = vmatpush1.bf16.msra.mxu0 %v2940_v48  ;;  %v764_v47 = vld [vmem:[#allocation10 + $0xa8] sm:$0xff] }
 0x1f7   :  { %2435 = vmatprep.mubr.bf16.mxu1 %v3360_v13  ;;  %2476 = vmatprep.mubr.bf16.mxu0 %v3362_v14  ;;  %v888_v48 = vld [vmem:[#allocation10 + $0x488] sm:$0xff]  ;;  %v2773_v54 = vcombine.high %v760_v46, %v764_v47  ;;  %v2772_v60 = vcombine.low %v760_v46, %v764_v47 }
 0x1f8   :  { %2405 = vmatprep.subr.bf16.mxu1 %v2805_v18  ;;  %2446 = vmatprep.subr.bf16.mxu0 %v2933_v19  ;;  %v2901_v55 = vcombine.high %v888_v48, %v892_v49  ;;  %v2900_v61 = vcombine.low %v888_v48, %v892_v49  ;;  %v2877_v18 = vcombine.high %v864_v8, %v868_v9  ;;  %v844_v40 = vld [vmem:[#allocation10 + $0x328] sm:$0xff] }
 0x1f9   :  { %v3005_v19 = vcombine.high %v992_v10, %v996_v11  ;;  %v968_v41 = vld [vmem:[#allocation10 + $0x708] sm:$0xff] }
 0x1fa   :  { %2406 = vmatpush1.bf16.msra.mxu1 %v2804_v23  ;;  %2447 = vmatpush1.bf16.msra.mxu0 %v2932_v24  ;;  %v988_v23 = vld [vmem:[#allocation10 + $0x7a8] sm:$0xff]  ;;  %v2876_v24 = vcombine.low %v864_v8, %v868_v9 }
 0x1fb   :  { %2407 = vmatprep.subr.bf16.mxu1 %v2797_v25  ;;  %2448 = vmatprep.subr.bf16.mxu0 %v2925_v26  ;;  %v3004_v25 = vcombine.low %v992_v10, %v996_v11  ;;  %v2869_v26 = vcombine.high %v856_v20, %v860_v21  ;;  %v2997_v27 = vcombine.high %v984_v22, %v988_v23  ;;  %v832_v47 = vld [vmem:[#allocation10 + $0x2c8] sm:$0xff] }
 0x1fc   :  { %v836_v48 = vld [vmem:[#allocation10 + $0x2e8] sm:$0xff] }
 0x1fd   :  { %v960_v49 = vld [vmem:[#allocation10 + $0x6c8] sm:$0xff] }
 0x1fe   :  { %2408 = vmatpush1.bf16.msra.mxu1 %v2796_v34  ;;  %2449 = vmatpush1.bf16.msra.mxu0 %v2924_v35  ;;  %v980_v34 = vld [vmem:[#allocation10 + $0x768] sm:$0xff]  ;;  %v2868_v35 = vcombine.low %v856_v20, %v860_v21  ;;  %v801_v21 = vld [vmem:[#allocation10 + $0x1d0] sm:$0xff] }
 0x1ff   :  { %2409 = vmatprep.subr.bf16.mxu1 %v2789_v36  ;;  %2450 = vmatprep.subr.bf16.mxu0 %v2917_v37  ;;  %v2996_v36 = vcombine.low %v984_v22, %v988_v23  ;;  %v2861_v37 = vcombine.high %v848_v30, %v852_v32  ;;  %v2989_v38 = vcombine.high %v976_v33, %v980_v34  ;;  %v824_v57 = vld [vmem:[#allocation10 + $0x288] sm:$0xff]  ;;  %v805_v22 = vld [vmem:[#allocation10 + $0x1f0] sm:$0xff] }
 0x200   :  { %v828_v58 = vld [vmem:[#allocation10 + $0x2a8] sm:$0xff]  ;;  %v929_v23 = vld [vmem:[#allocation10 + $0x5d0] sm:$0xff] }
 0x201   :  { %v952_v59 = vld [vmem:[#allocation10 + $0x688] sm:$0xff] }
 0x202   :  { %2410 = vmatpush1.bf16.msra.mxu1 %v2788_v42  ;;  %2451 = vmatpush1.bf16.msra.mxu0 %v2916_v43  ;;  %v972_v42 = vld [vmem:[#allocation10 + $0x728] sm:$0xff]  ;;  %v2860_v43 = vcombine.low %v848_v30, %v852_v32  ;;  %v793_v32 = vld [vmem:[#allocation10 + $0x190] sm:$0xff] }
 0x203   :  { %2411 = vmatprep.subr.bf16.mxu1 %v2781_v44  ;;  %2452 = vmatprep.subr.bf16.mxu0 %v2909_v45  ;;  %v2988_v44 = vcombine.low %v976_v33, %v980_v34  ;;  %v2853_v45 = vcombine.high %v840_v39, %v844_v40  ;;  %v2981_v46 = vcombine.high %v968_v41, %v972_v42  ;;  %v816_v1 = vld [vmem:[#allocation10 + $0x248] sm:$0xff]  ;;  %v797_v33 = vld [vmem:[#allocation10 + $0x1b0] sm:$0xff] }
 0x204   :  { %v820_v2 = vld [vmem:[#allocation10 + $0x268] sm:$0xff]  ;;  %v921_v34 = vld [vmem:[#allocation10 + $0x590] sm:$0xff] }
 0x205   :  { %v944_v3 = vld [vmem:[#allocation10 + $0x648] sm:$0xff] }
 0x206   :  { %2412 = vmatpush1.bf16.msra.mxu1 %v2780_v51  ;;  %2453 = vmatpush1.bf16.msra.mxu0 %v2908_v53  ;;  %v964_v51 = vld [vmem:[#allocation10 + $0x6e8] sm:$0xff]  ;;  %v2852_v53 = vcombine.low %v840_v39, %v844_v40  ;;  %v785_v40 = vld [vmem:[#allocation10 + $0x150] sm:$0xff] }
 0x207   :  { %2413 = vmatprep.subr.bf16.mxu1 %v2773_v54  ;;  %2454 = vmatprep.subr.bf16.mxu0 %v2901_v55  ;;  %v2980_v54 = vcombine.low %v968_v41, %v972_v42  ;;  %v2845_v55 = vcombine.high %v832_v47, %v836_v48  ;;  %v2973_v56 = vcombine.high %v960_v49, %v964_v51  ;;  %v808_v9 = vld [vmem:[#allocation10 + $0x208] sm:$0xff]  ;;  %v789_v41 = vld [vmem:[#allocation10 + $0x170] sm:$0xff] }
 0x208   :  { %v812_v10 = vld [vmem:[#allocation10 + $0x228] sm:$0xff]  ;;  %v913_v42 = vld [vmem:[#allocation10 + $0x550] sm:$0xff] }
 0x209   :  { %v936_v11 = vld [vmem:[#allocation10 + $0x608] sm:$0xff] }
 0x20a   :  { %2414 = vmatpush1.bf16.msra.mxu1 %v2772_v60  ;;  %2455 = vmatpush1.bf16.msra.mxu0 %v2900_v61  ;;  %v956_v60 = vld [vmem:[#allocation10 + $0x6a8] sm:$0xff]  ;;  %v2844_v61 = vcombine.low %v832_v47, %v836_v48  ;;  %v777_v48 = vld [vmem:[#allocation10 + $0x110] sm:$0xff] }
 0x20b   :  { %2415 = vmatprep.subr.bf16.mxu1 %v2765_v62  ;;  %2456 = vmatprep.subr.bf16.mxu0 %v2893_v63  ;;  %v2972_v62 = vcombine.low %v960_v49, %v964_v51  ;;  %v2837_v63 = vcombine.high %v824_v57, %v828_v58  ;;  %v2965_v0 = vcombine.high %v952_v59, %v956_v60  ;;  %v781_v49 = vld [vmem:[#allocation10 + $0x130] sm:$0xff] }
 0x20c   :  { %v905_v51 = vld [vmem:[#allocation10 + $0x510] sm:$0xff] }
 0x20e   :  { %2416 = vmatpush1.bf16.msra.mxu1 %v2764_v4  ;;  %2457 = vmatpush1.bf16.msra.mxu0 %v2892_v5  ;;  %v948_v4 = vld [vmem:[#allocation10 + $0x668] sm:$0xff]  ;;  %v2836_v5 = vcombine.low %v824_v57, %v828_v58  ;;  %v769_v58 = vld [vmem:[#allocation10 + $0xd0] sm:$0xff] }
 0x20f   :  { %2417 = vmatprep.subr.bf16.mxu1 %v2757_v6  ;;  %2458 = vmatprep.subr.bf16.mxu0 %v2885_v7  ;;  %v2964_v6 = vcombine.low %v952_v59, %v956_v60  ;;  %v2829_v7 = vcombine.high %v816_v1, %v820_v2  ;;  %v2957_v8 = vcombine.high %v944_v3, %v948_v4  ;;  %v773_v59 = vld [vmem:[#allocation10 + $0xf0] sm:$0xff] }
 0x210   :  { %v897_v60 = vld [vmem:[#allocation10 + $0x4d0] sm:$0xff] }
 0x212   :  { %2418 = vmatpush1.bf16.msra.mxu1 %v2756_v12  ;;  %2459 = vmatpush1.bf16.msra.mxu0 %v2884_v17  ;;  %v940_v12 = vld [vmem:[#allocation10 + $0x628] sm:$0xff]  ;;  %v2828_v17 = vcombine.low %v816_v1, %v820_v2  ;;  %v761_v2 = vld [vmem:[#allocation10 + $0x90] sm:$0xff] }
 0x213   :  { %2419 = vmatprep.subr.bf16.mxu1 %v2877_v18  ;;  %2460 = vmatprep.subr.bf16.mxu0 %v3005_v19  ;;  %v2956_v18 = vcombine.low %v944_v3, %v948_v4  ;;  %v2821_v19 = vcombine.high %v808_v9, %v812_v10  ;;  %v2949_v20 = vcombine.high %v936_v11, %v940_v12  ;;  %v765_v3 = vld [vmem:[#allocation10 + $0xb0] sm:$0xff] }
 0x214   :  { %v889_v4 = vld [vmem:[#allocation10 + $0x490] sm:$0xff] }
 0x216   :  { %2420 = vmatpush2.bf16.msra.mxu1 %v2876_v24  ;;  %2461 = vmatpush2.bf16.msra.mxu0 %v3004_v25  ;;  %v933_v24 = vld [vmem:[#allocation10 + $0x5f0] sm:$0xff]  ;;  %v2820_v25 = vcombine.low %v808_v9, %v812_v10 }
 0x217   :  { %2421 = vmatprep.subr.bf16.mxu1 %v2869_v26  ;;  %2462 = vmatprep.subr.bf16.mxu0 %v2997_v27  ;;  %v2948_v26 = vcombine.low %v936_v11, %v940_v12  ;;  %v2815_v27 = vcombine.high %v801_v21, %v805_v22  ;;  %v2943_v30 = vcombine.high %v929_v23, %v933_v24  ;;  %v753_v10 = vld [vmem:[#allocation10 + $0x50] sm:$0xff] }
 0x218   :  { %v757_v11 = vld [vmem:[#allocation10 + $0x70] sm:$0xff] }
 0x219   :  { %v881_v12 = vld [vmem:[#allocation10 + $0x450] sm:$0xff] }
 0x21a   :  { %2422 = vmatpush2.bf16.msra.mxu1 %v2868_v35  ;;  %2463 = vmatpush2.bf16.msra.mxu0 %v2996_v36  ;;  %v925_v35 = vld [vmem:[#allocation10 + $0x5b0] sm:$0xff]  ;;  %v2814_v36 = vcombine.low %v801_v21, %v805_v22 }
 0x21b   :  { %2423 = vmatprep.subr.bf16.mxu1 %v2861_v37  ;;  %2464 = vmatprep.subr.bf16.mxu0 %v2989_v38  ;;  %v2942_v37 = vcombine.low %v929_v23, %v933_v24  ;;  %v2807_v38 = vcombine.high %v793_v32, %v797_v33  ;;  %v2935_v39 = vcombine.high %v921_v34, %v925_v35  ;;  %v745_v22 = vld [vmem:[#allocation10 + $0x10] sm:$0xff] }
 0x21c   :  { %v749_v23 = vld [vmem:[#allocation10 + $0x30] sm:$0xff] }
 0x21d   :  { %v873_v24 = vld [vmem:[#allocation10 + $0x410] sm:$0xff] }
 0x21e   :  { %2424 = vmatpush2.bf16.msra.mxu1 %v2860_v43  ;;  %2465 = vmatpush2.bf16.msra.mxu0 %v2988_v44  ;;  %v917_v43 = vld [vmem:[#allocation10 + $0x570] sm:$0xff]  ;;  %v2806_v44 = vcombine.low %v793_v32, %v797_v33 }
 0x21f   :  { %2425 = vmatprep.subr.bf16.mxu1 %v2853_v45  ;;  %2466 = vmatprep.subr.bf16.mxu0 %v2981_v46  ;;  %v2934_v45 = vcombine.low %v921_v34, %v925_v35  ;;  %v2799_v46 = vcombine.high %v785_v40, %v789_v41  ;;  %v2927_v47 = vcombine.high %v913_v42, %v917_v43  ;;  %v865_v33 = vld [vmem:[#allocation10 + $0x3d0] sm:$0xff] }
 0x220   :  { %v869_v34 = vld [vmem:[#allocation10 + $0x3f0] sm:$0xff] }
 0x221   :  { %v993_v35 = vld [vmem:[#allocation10 + $0x7d0] sm:$0xff] }
 0x222   :  { %2426 = vmatpush2.bf16.msra.mxu1 %v2852_v53  ;;  %2467 = vmatpush2.bf16.msra.mxu0 %v2980_v54  ;;  %v909_v53 = vld [vmem:[#allocation10 + $0x530] sm:$0xff]  ;;  %v2798_v54 = vcombine.low %v785_v40, %v789_v41 }
 0x223   :  { %2427 = vmatprep.subr.bf16.mxu1 %v2845_v55  ;;  %2468 = vmatprep.subr.bf16.mxu0 %v2973_v56  ;;  %v2926_v55 = vcombine.low %v913_v42, %v917_v43  ;;  %v2791_v56 = vcombine.high %v777_v48, %v781_v49  ;;  %v2919_v57 = vcombine.high %v905_v51, %v909_v53  ;;  %v857_v41 = vld [vmem:[#allocation10 + $0x390] sm:$0xff] }
 0x224   :  { %v861_v42 = vld [vmem:[#allocation10 + $0x3b0] sm:$0xff] }
 0x225   :  { %v985_v43 = vld [vmem:[#allocation10 + $0x790] sm:$0xff] }
 0x226   :  { %2428 = vmatpush2.bf16.msra.mxu1 %v2844_v61  ;;  %2469 = vmatpush2.bf16.msra.mxu0 %v2972_v62  ;;  %v901_v61 = vld [vmem:[#allocation10 + $0x4f0] sm:$0xff]  ;;  %v2790_v62 = vcombine.low %v777_v48, %v781_v49 }
 0x227   :  { %2429 = vmatprep.subr.bf16.mxu1 %v2837_v63  ;;  %2470 = vmatprep.subr.bf16.mxu0 %v2965_v0  ;;  %v2918_v63 = vcombine.low %v905_v51, %v909_v53  ;;  %v2783_v0 = vcombine.high %v769_v58, %v773_v59  ;;  %v2911_v1 = vcombine.high %v897_v60, %v901_v61  ;;  %v849_v49 = vld [vmem:[#allocation10 + $0x350] sm:$0xff] }
 0x228   :  { %v853_v51 = vld [vmem:[#allocation10 + $0x370] sm:$0xff] }
 0x229   :  { %v977_v53 = vld [vmem:[#allocation10 + $0x750] sm:$0xff] }
 0x22a   :  { %2430 = vmatpush2.bf16.msra.mxu1 %v2836_v5  ;;  %2471 = vmatpush2.bf16.msra.mxu0 %v2964_v6  ;;  %v893_v5 = vld [vmem:[#allocation10 + $0x4b0] sm:$0xff]  ;;  %v2782_v6 = vcombine.low %v769_v58, %v773_v59 }
 0x22b   :  { %2431 = vmatprep.subr.bf16.mxu1 %v2829_v7  ;;  %2472 = vmatprep.subr.bf16.mxu0 %v2957_v8  ;;  %v2910_v7 = vcombine.low %v897_v60, %v901_v61  ;;  %v2775_v8 = vcombine.high %v761_v2, %v765_v3  ;;  %v2903_v9 = vcombine.high %v889_v4, %v893_v5  ;;  %v841_v59 = vld [vmem:[#allocation10 + $0x310] sm:$0xff] }
 0x22c   :  { %v845_v60 = vld [vmem:[#allocation10 + $0x330] sm:$0xff] }
 0x22d   :  { %v969_v61 = vld [vmem:[#allocation10 + $0x710] sm:$0xff] }
 0x22e   :  { %2432 = vmatpush2.bf16.msra.mxu1 %v2828_v17  ;;  %2473 = vmatpush2.bf16.msra.mxu0 %v2956_v18  ;;  %v885_v17 = vld [vmem:[#allocation10 + $0x470] sm:$0xff]  ;;  %v2774_v18 = vcombine.low %v761_v2, %v765_v3 }
 0x22f   :  { %2433 = vmatprep.subr.bf16.mxu1 %v2821_v19  ;;  %2474 = vmatprep.subr.bf16.mxu0 %v2949_v20  ;;  %v2902_v19 = vcombine.low %v889_v4, %v893_v5  ;;  %v2767_v20 = vcombine.high %v753_v10, %v757_v11  ;;  %v2895_v21 = vcombine.high %v881_v12, %v885_v17  ;;  %v833_v3 = vld [vmem:[#allocation10 + $0x2d0] sm:$0xff] }
 0x230   :  { %v837_v4 = vld [vmem:[#allocation10 + $0x2f0] sm:$0xff] }
 0x231   :  { %v961_v5 = vld [vmem:[#allocation10 + $0x6d0] sm:$0xff] }
 0x232   :  { %2434 = vmatpush2.bf16.msra.mxu1 %v2820_v25  ;;  %2475 = vmatpush2.bf16.msra.mxu0 %v2948_v26  ;;  %v877_v25 = vld [vmem:[#allocation10 + $0x430] sm:$0xff]  ;;  %v2766_v26 = vcombine.low %v753_v10, %v757_v11 }
 0x233   :  { %2485 = vmatprep.subr.bf16.mxu1 %v2815_v27  ;;  %2526 = vmatprep.subr.bf16.mxu0 %v2943_v30  ;;  %v2894_v27 = vcombine.low %v881_v12, %v885_v17  ;;  %v2759_v30 = vcombine.high %v745_v22, %v749_v23  ;;  %v2887_v32 = vcombine.high %v873_v24, %v877_v25  ;;  %v825_v11 = vld [vmem:[#allocation10 + $0x290] sm:$0xff] }
 0x234   :  { %v829_v12 = vld [vmem:[#allocation10 + $0x2b0] sm:$0xff] }
 0x235   :  { %2436 = vmatmul.mubr.bf16.vlgmr.msra.gmra.mxu1 %v3364_v15  ;;  %2477 = vmatmul.mubr.bf16.vlgmr.msra.gmra.mxu0 %v3366_v16  ;;  %v953_v17 = vld [vmem:[#allocation10 + $0x690] sm:$0xff] }
 0x236   :  { %2486 = vmatpush1.bf16.msra.mxu1 %v2814_v36  ;;  %2517 = vmatprep.mubr.bf16.mxu1 %v3360_v13  ;;  %v997_v36 = vld [vmem:[#allocation10 + $0x7f0] sm:$0xff] }
 0x237   :  { %2527 = vmatpush1.bf16.msra.mxu0 %v2942_v37  ;;  %2558 = vmatprep.mubr.bf16.mxu0 %v3362_v14  ;;  %v2758_v37 = vcombine.low %v745_v22, %v749_v23  ;;  %v3007_v40 = vcombine.high %v993_v35, %v997_v36  ;;  %v817_v23 = vld [vmem:[#allocation10 + $0x250] sm:$0xff] }
 0x238   :  { %2487 = vmatprep.subr.bf16.mxu1 %v2807_v38  ;;  %2528 = vmatprep.subr.bf16.mxu0 %v2935_v39  ;;  %v2886_v38 = vcombine.low %v873_v24, %v877_v25  ;;  %v2879_v39 = vcombine.high %v865_v33, %v869_v34  ;;  %v821_v24 = vld [vmem:[#allocation10 + $0x270] sm:$0xff] }
 0x239   :  { %v945_v25 = vld [vmem:[#allocation10 + $0x650] sm:$0xff] }
 0x23a   :  { %2488 = vmatpush1.bf16.msra.mxu1 %v2806_v44  ;;  %v989_v44 = vld [vmem:[#allocation10 + $0x7b0] sm:$0xff] }
 0x23b   :  { %2529 = vmatpush1.bf16.msra.mxu0 %v2934_v45  ;;  %2489 = vmatprep.subr.bf16.mxu1 %v2799_v46  ;;  %v2878_v45 = vcombine.low %v865_v33, %v869_v34  ;;  %v3006_v46 = vcombine.low %v993_v35, %v997_v36  ;;  %v2999_v48 = vcombine.high %v985_v43, %v989_v44  ;;  %v809_v34 = vld [vmem:[#allocation10 + $0x210] sm:$0xff] }
 0x23c   :  { %2530 = vmatprep.subr.bf16.mxu0 %v2927_v47  ;;  %v2871_v47 = vcombine.high %v857_v41, %v861_v42  ;;  %v813_v35 = vld [vmem:[#allocation10 + $0x230] sm:$0xff] }
 0x23d   :  { %v937_v36 = vld [vmem:[#allocation10 + $0x610] sm:$0xff] }
 0x23e   :  { %2490 = vmatpush1.bf16.msra.mxu1 %v2798_v54  ;;  %v981_v54 = vld [vmem:[#allocation10 + $0x770] sm:$0xff] }
 0x23f   :  { %2531 = vmatpush1.bf16.msra.mxu0 %v2926_v55  ;;  %2491 = vmatprep.subr.bf16.mxu1 %v2791_v56  ;;  %v2870_v55 = vcombine.low %v857_v41, %v861_v42  ;;  %v2998_v56 = vcombine.low %v985_v43, %v989_v44  ;;  %v2991_v58 = vcombine.high %v977_v53, %v981_v54  ;;  %v802_v42 = vld [vmem:[#allocation10 + $0x1d8] sm:$0xff] }
 0x240   :  { %2532 = vmatprep.subr.bf16.mxu0 %v2919_v57  ;;  %v2863_v57 = vcombine.high %v849_v49, %v853_v51  ;;  %v806_v43 = vld [vmem:[#allocation10 + $0x1f8] sm:$0xff] }
 0x241   :  { %v930_v44 = vld [vmem:[#allocation10 + $0x5d8] sm:$0xff] }
 0x242   :  { %2492 = vmatpush1.bf16.msra.mxu1 %v2790_v62  ;;  %v973_v62 = vld [vmem:[#allocation10 + $0x730] sm:$0xff] }
 0x243   :  { %2533 = vmatpush1.bf16.msra.mxu0 %v2918_v63  ;;  %2493 = vmatprep.subr.bf16.mxu1 %v2783_v0  ;;  %v2862_v63 = vcombine.low %v849_v49, %v853_v51  ;;  %v2990_v0 = vcombine.low %v977_v53, %v981_v54  ;;  %v2983_v2 = vcombine.high %v969_v61, %v973_v62  ;;  %v794_v51 = vld [vmem:[#allocation10 + $0x198] sm:$0xff] }
 0x244   :  { %2534 = vmatprep.subr.bf16.mxu0 %v2911_v1  ;;  %v2855_v1 = vcombine.high %v841_v59, %v845_v60  ;;  %v798_v53 = vld [vmem:[#allocation10 + $0x1b8] sm:$0xff]  ;;  %v2816_v54 = vcombine.low %v802_v42, %v806_v43 }
 0x246   :  { %2494 = vmatpush1.bf16.msra.mxu1 %v2782_v6  ;;  %v965_v6 = vld [vmem:[#allocation10 + $0x6f0] sm:$0xff] }
 0x247   :  { %2535 = vmatpush1.bf16.msra.mxu0 %v2910_v7  ;;  %2495 = vmatprep.subr.bf16.mxu1 %v2775_v8  ;;  %v2854_v7 = vcombine.low %v841_v59, %v845_v60  ;;  %v2982_v8 = vcombine.low %v969_v61, %v973_v62  ;;  %v2975_v10 = vcombine.high %v961_v5, %v965_v6  ;;  %v786_v59 = vld [vmem:[#allocation10 + $0x158] sm:$0xff] }
 0x248   :  { %2536 = vmatprep.subr.bf16.mxu0 %v2903_v9  ;;  %v2847_v9 = vcombine.high %v833_v3, %v837_v4  ;;  %v790_v60 = vld [vmem:[#allocation10 + $0x178] sm:$0xff] }
 0x249   :  { %v914_v62 = vld [vmem:[#allocation10 + $0x558] sm:$0xff] }
 0x24a   :  { %2496 = vmatpush1.bf16.msra.mxu1 %v2774_v18  ;;  %v957_v18 = vld [vmem:[#allocation10 + $0x6b0] sm:$0xff] }
 0x24b   :  { %2537 = vmatpush1.bf16.msra.mxu0 %v2902_v19  ;;  %2497 = vmatprep.subr.bf16.mxu1 %v2767_v20  ;;  %v2846_v19 = vcombine.low %v833_v3, %v837_v4  ;;  %v2974_v20 = vcombine.low %v961_v5, %v965_v6  ;;  %v2967_v22 = vcombine.high %v953_v17, %v957_v18  ;;  %v778_v4 = vld [vmem:[#allocation10 + $0x118] sm:$0xff] }
 0x24c   :  { %2538 = vmatprep.subr.bf16.mxu0 %v2895_v21  ;;  %v2839_v21 = vcombine.high %v825_v11, %v829_v12  ;;  %v782_v5 = vld [vmem:[#allocation10 + $0x138] sm:$0xff] }
 0x24d   :  { %v906_v6 = vld [vmem:[#allocation10 + $0x518] sm:$0xff] }
 0x24e   :  { %2498 = vmatpush1.bf16.msra.mxu1 %v2766_v26  ;;  %v949_v26 = vld [vmem:[#allocation10 + $0x670] sm:$0xff] }
 0x24f   :  { %2539 = vmatpush1.bf16.msra.mxu0 %v2894_v27  ;;  %2499 = vmatprep.subr.bf16.mxu1 %v2759_v30  ;;  %v2838_v27 = vcombine.low %v825_v11, %v829_v12  ;;  %v2966_v30 = vcombine.low %v953_v17, %v957_v18  ;;  %v2959_v33 = vcombine.high %v945_v25, %v949_v26  ;;  %v770_v11 = vld [vmem:[#allocation10 + $0xd8] sm:$0xff] }
 0x250   :  { %2540 = vmatprep.subr.bf16.mxu0 %v2887_v32  ;;  %v2831_v32 = vcombine.high %v817_v23, %v821_v24  ;;  %v774_v12 = vld [vmem:[#allocation10 + $0xf8] sm:$0xff] }
 0x251   :  { %v898_v17 = vld [vmem:[#allocation10 + $0x4d8] sm:$0xff] }
 0x252   :  { %2500 = vmatpush1.bf16.msra.mxu1 %v2758_v37  ;;  %v941_v37 = vld [vmem:[#allocation10 + $0x630] sm:$0xff]  ;;  %v902_v18 = vld [vmem:[#allocation10 + $0x4f8] sm:$0xff] }
 0x253   :  { %2541 = vmatpush1.bf16.msra.mxu0 %v2886_v38  ;;  %2501 = vmatprep.subr.bf16.mxu1 %v2879_v39  ;;  %v2830_v38 = vcombine.low %v817_v23, %v821_v24  ;;  %v2958_v39 = vcombine.low %v945_v25, %v949_v26  ;;  %v2951_v41 = vcombine.high %v937_v36, %v941_v37  ;;  %v766_v23 = vld [vmem:[#allocation10 + $0xb8] sm:$0xff] }
 0x254   :  { %2542 = vmatprep.subr.bf16.mxu0 %v3007_v40  ;;  %v2823_v40 = vcombine.high %v809_v34, %v813_v35  ;;  %v890_v24 = vld [vmem:[#allocation10 + $0x498] sm:$0xff]  ;;  %v2784_v26 = vcombine.low %v770_v11, %v774_v12 }
 0x255   :  { %v894_v25 = vld [vmem:[#allocation10 + $0x4b8] sm:$0xff] }
 0x256   :  { %2502 = vmatpush2.bf16.msra.mxu1 %v2878_v45  ;;  %v934_v45 = vld [vmem:[#allocation10 + $0x5f8] sm:$0xff] }
 0x257   :  { %2543 = vmatpush2.bf16.msra.mxu0 %v3006_v46  ;;  %2503 = vmatprep.subr.bf16.mxu1 %v2871_v47  ;;  %v2822_v46 = vcombine.low %v809_v34, %v813_v35  ;;  %v2950_v47 = vcombine.low %v937_v36, %v941_v37  ;;  %v2945_v49 = vcombine.high %v930_v44, %v934_v45  ;;  %v758_v34 = vld [vmem:[#allocation10 + $0x78] sm:$0xff] }
 0x258   :  { %2544 = vmatprep.subr.bf16.mxu0 %v2999_v48  ;;  %v2817_v48 = vcombine.high %v802_v42, %v806_v43  ;;  %v882_v35 = vld [vmem:[#allocation10 + $0x458] sm:$0xff] }
 0x259   :  { %v886_v36 = vld [vmem:[#allocation10 + $0x478] sm:$0xff] }
 0x25a   :  { %2504 = vmatpush2.bf16.msra.mxu1 %v2870_v55  ;;  %v922_v55 = vld [vmem:[#allocation10 + $0x598] sm:$0xff] }
 0x25b   :  { %2545 = vmatpush2.bf16.msra.mxu0 %v2998_v56  ;;  %2505 = vmatprep.subr.bf16.mxu1 %v2863_v57  ;;  %v926_v56 = vld [vmem:[#allocation10 + $0x5b8] sm:$0xff]  ;;  %v2944_v57 = vcombine.low %v930_v44, %v934_v45 }
 0x25c   :  { %2546 = vmatprep.subr.bf16.mxu0 %v2991_v58  ;;  %v2809_v58 = vcombine.high %v794_v51, %v798_v53  ;;  %v2937_v61 = vcombine.high %v922_v55, %v926_v56  ;;  %v750_v42 = vld [vmem:[#allocation10 + $0x38] sm:$0xff] }
 0x25d   :  { %v874_v43 = vld [vmem:[#allocation10 + $0x418] sm:$0xff] }
 0x25e   :  { %2506 = vmatpush2.bf16.msra.mxu1 %v2862_v63  ;;  %v918_v63 = vld [vmem:[#allocation10 + $0x578] sm:$0xff] }
 0x25f   :  { %2547 = vmatpush2.bf16.msra.mxu0 %v2990_v0  ;;  %2507 = vmatprep.subr.bf16.mxu1 %v2855_v1  ;;  %v2808_v0 = vcombine.low %v794_v51, %v798_v53  ;;  %v2936_v1 = vcombine.low %v922_v55, %v926_v56  ;;  %v2929_v3 = vcombine.high %v914_v62, %v918_v63  ;;  %v878_v44 = vld [vmem:[#allocation10 + $0x438] sm:$0xff] }
 0x260   :  { %2548 = vmatprep.subr.bf16.mxu0 %v2983_v2  ;;  %v2801_v2 = vcombine.high %v786_v59, %v790_v60  ;;  %v870_v51 = vld [vmem:[#allocation10 + $0x3f8] sm:$0xff]  ;;  %v2888_v56 = vcombine.low %v874_v43, %v878_v44 }
 0x261   :  { %v994_v53 = vld [vmem:[#allocation10 + $0x7d8] sm:$0xff] }
 0x262   :  { %2508 = vmatpush2.bf16.msra.mxu1 %v2854_v7  ;;  %v910_v7 = vld [vmem:[#allocation10 + $0x538] sm:$0xff] }
 0x263   :  { %2549 = vmatpush2.bf16.msra.mxu0 %v2982_v8  ;;  %2509 = vmatprep.subr.bf16.mxu1 %v2847_v9  ;;  %v2800_v8 = vcombine.low %v786_v59, %v790_v60  ;;  %v2928_v9 = vcombine.low %v914_v62, %v918_v63  ;;  %v858_v59 = vld [vmem:[#allocation10 + $0x398] sm:$0xff] }
 0x264   :  { %2550 = vmatprep.subr.bf16.mxu0 %v2975_v10  ;;  %v2793_v10 = vcombine.high %v778_v4, %v782_v5  ;;  %v862_v60 = vld [vmem:[#allocation10 + $0x3b8] sm:$0xff] }
 0x265   :  { %v990_v62 = vld [vmem:[#allocation10 + $0x7b8] sm:$0xff] }
 0x266   :  { %2510 = vmatpush2.bf16.msra.mxu1 %v2846_v19  ;;  %v2920_v19 = vcombine.low %v906_v6, %v910_v7 }
 0x267   :  { %2551 = vmatpush2.bf16.msra.mxu0 %v2974_v20  ;;  %2511 = vmatprep.subr.bf16.mxu1 %v2839_v21  ;;  %v2785_v20 = vcombine.high %v770_v11, %v774_v12  ;;  %v2913_v21 = vcombine.high %v898_v17, %v902_v18  ;;  %v846_v11 = vld [vmem:[#allocation10 + $0x338] sm:$0xff] }
 0x268   :  { %2552 = vmatprep.subr.bf16.mxu0 %v2967_v22  ;;  %v762_v22 = vld [vmem:[#allocation10 + $0x98] sm:$0xff] }
 0x269   :  { %v2776_v37 = vcombine.low %v762_v22, %v766_v23  ;;  %v970_v12 = vld [vmem:[#allocation10 + $0x718] sm:$0xff] }
 0x26a   :  { %2512 = vmatpush2.bf16.msra.mxu1 %v2838_v27  ;;  %v2912_v27 = vcombine.low %v898_v17, %v902_v18  ;;  %v974_v17 = vld [vmem:[#allocation10 + $0x738] sm:$0xff] }
 0x26b   :  { %2553 = vmatpush2.bf16.msra.mxu0 %v2966_v30  ;;  %2513 = vmatprep.subr.bf16.mxu1 %v2831_v32  ;;  %v2777_v30 = vcombine.high %v762_v22, %v766_v23  ;;  %v2905_v32 = vcombine.high %v890_v24, %v894_v25  ;;  %v838_v22 = vld [vmem:[#allocation10 + $0x2f8] sm:$0xff] }
 0x26c   :  { %2554 = vmatprep.subr.bf16.mxu0 %v2959_v33  ;;  %v754_v33 = vld [vmem:[#allocation10 + $0x58] sm:$0xff] }
 0x26d   :  { %v2768_v45 = vcombine.low %v754_v33, %v758_v34  ;;  %v962_v23 = vld [vmem:[#allocation10 + $0x6d8] sm:$0xff] }
 0x26e   :  { %2514 = vmatpush2.bf16.msra.mxu1 %v2830_v38  ;;  %v2904_v38 = vcombine.low %v890_v24, %v894_v25  ;;  %v966_v24 = vld [vmem:[#allocation10 + $0x6f8] sm:$0xff] }
 0x26f   :  { %2555 = vmatpush2.bf16.msra.mxu0 %v2958_v39  ;;  %2515 = vmatprep.subr.bf16.mxu1 %v2823_v40  ;;  %v2769_v39 = vcombine.high %v754_v33, %v758_v34  ;;  %v2897_v40 = vcombine.high %v882_v35, %v886_v36  ;;  %v830_v33 = vld [vmem:[#allocation10 + $0x2b8] sm:$0xff] }
 0x270   :  { %2556 = vmatprep.subr.bf16.mxu0 %v2951_v41  ;;  %v746_v41 = vld [vmem:[#allocation10 + $0x18] sm:$0xff] }
 0x271   :  { %v2760_v55 = vcombine.low %v746_v41, %v750_v42  ;;  %v954_v34 = vld [vmem:[#allocation10 + $0x698] sm:$0xff] }
 0x272   :  { %2516 = vmatpush2.bf16.msra.mxu1 %v2822_v46  ;;  %v2896_v46 = vcombine.low %v882_v35, %v886_v36  ;;  %v958_v35 = vld [vmem:[#allocation10 + $0x6b8] sm:$0xff] }
 0x273   :  { %2557 = vmatpush2.bf16.msra.mxu0 %v2950_v47  ;;  %2567 = vmatprep.subr.bf16.mxu1 %v2817_v48  ;;  %v2761_v47 = vcombine.high %v746_v41, %v750_v42  ;;  %v2889_v48 = vcombine.high %v874_v43, %v878_v44  ;;  %v822_v41 = vld [vmem:[#allocation10 + $0x278] sm:$0xff] }
 0x274   :  { %2608 = vmatprep.subr.bf16.mxu0 %v2945_v49  ;;  %v866_v49 = vld [vmem:[#allocation10 + $0x3d8] sm:$0xff] }
 0x275   :  { %2518 = vmatmul.mubr.bf16.vlgmr.msra.gmra.mxu1 %v3364_v15  ;;  %v2880_v63 = vcombine.low %v866_v49, %v870_v51  ;;  %v946_v42 = vld [vmem:[#allocation10 + $0x658] sm:$0xff] }
 0x276   :  { %2559 = vmatmul.mubr.bf16.vlgmr.msra.gmra.mxu0 %v3366_v16  ;;  %2568 = vmatpush1.bf16.msra.mxu1 %v2816_v54  ;;  %v998_v54 = vld [vmem:[#allocation10 + $0x7f8] sm:$0xff] }
 0x277   :  { %2599 = vmatprep.mubr.bf16.mxu1 %v3360_v13  ;;  %2609 = vmatpush1.bf16.msra.mxu0 %v2944_v57  ;;  %v2921_v13 = vcombine.high %v906_v6, %v910_v7  ;;  %v2881_v57 = vcombine.high %v866_v49, %v870_v51  ;;  %v982_v6 = vld [vmem:[#allocation10 + $0x778] sm:$0xff]  ;;  %v2872_v7 = vcombine.low %v858_v59, %v862_v60 }
 0x278   :  { %2640 = vmatprep.mubr.bf16.mxu0 %v3362_v14  ;;  %2569 = vmatprep.subr.bf16.mxu1 %v2809_v58  ;;  %v2792_v14 = vcombine.low %v778_v4, %v782_v5  ;;  %v3009_v58 = vcombine.high %v994_v53, %v998_v54  ;;  %v854_v4 = vld [vmem:[#allocation10 + $0x378] sm:$0xff] }
 0x279   :  { %2610 = vmatprep.subr.bf16.mxu0 %v2937_v61  ;;  %v986_v61 = vld [vmem:[#allocation10 + $0x798] sm:$0xff] }
 0x27a   :  { %2570 = vmatpush1.bf16.msra.mxu1 %v2808_v0  ;;  %v3008_v0 = vcombine.low %v994_v53, %v998_v54  ;;  %v978_v5 = vld [vmem:[#allocation10 + $0x758] sm:$0xff] }
 0x27b   :  { %2611 = vmatpush1.bf16.msra.mxu0 %v2936_v1  ;;  %2571 = vmatprep.subr.bf16.mxu1 %v2801_v2  ;;  %v2873_v1 = vcombine.high %v858_v59, %v862_v60  ;;  %v3001_v2 = vcombine.high %v986_v61, %v990_v62  ;;  %v950_v43 = vld [vmem:[#allocation10 + $0x678] sm:$0xff] }
 0x27c   :  { %2612 = vmatprep.subr.bf16.mxu0 %v2929_v3  ;;  %v850_v3 = vld [vmem:[#allocation10 + $0x358] sm:$0xff] }
 0x27d   :  { %v2864_v18 = vcombine.low %v850_v3, %v854_v4  ;;  %v814_v49 = vld [vmem:[#allocation10 + $0x238] sm:$0xff] }
 0x27e   :  { %2572 = vmatpush1.bf16.msra.mxu1 %v2800_v8  ;;  %v3000_v8 = vcombine.low %v986_v61, %v990_v62  ;;  %v938_v51 = vld [vmem:[#allocation10 + $0x618] sm:$0xff] }
 0x27f   :  { %2613 = vmatpush1.bf16.msra.mxu0 %v2928_v9  ;;  %2573 = vmatprep.subr.bf16.mxu1 %v2793_v10  ;;  %v2865_v9 = vcombine.high %v850_v3, %v854_v4  ;;  %v2993_v10 = vcombine.high %v978_v5, %v982_v6  ;;  %v942_v53 = vld [vmem:[#allocation10 + $0x638] sm:$0xff] }
 0x280   :  { %2614 = vmatprep.subr.bf16.mxu0 %v2921_v13  ;;  %v842_v13 = vld [vmem:[#allocation10 + $0x318] sm:$0xff]  ;;  %v2952_v59 = vcombine.low %v938_v51, %v942_v53 }
 0x281   :  { %v2856_v25 = vcombine.low %v842_v13, %v846_v11  ;;  %v999_v60 = vld [vmem:[%s3406_s6] sm:$0xff]  ;;  %s3283_s6 = smov [#allocation11]  }
 0x282   :  { %2574 = vmatpush1.bf16.msra.mxu1 %v2792_v14  ;;  %v2992_v14 = vcombine.low %v978_v5, %v982_v6  ;;  %v1004_v61 = vrot.slane %v999_v60, %v3342_v29  ;;  %v1008_v62 = vrot.slane %v999_v60, %v3348_v31  ;;  %v1012_v31 = vrot.slane %v999_v60, %v323_v50  ;;  %s2663_s30 = sshll.u32 %s3283_s6, 4  ;;  %s2664_s30 = int_to_ptr.vmem [resolvable:$true] %s2663_s30 }
 0x283   :  { %2615 = vmatpush1.bf16.msra.mxu0 %v2920_v19  ;;  %2575 = vmatprep.subr.bf16.mxu1 %v2785_v20  ;;  %v2857_v19 = vcombine.high %v842_v13, %v846_v11  ;;  %v2985_v20 = vcombine.high %v970_v12, %v974_v17  ;;  %v1023_v50 = vsub.s32 5, %v3339_v28  ;;  %s3243_s8 = scalar_lea.vmem %s2664_s30, 1024  ;;  %p3248_p12 = scmp.lt.s32.totalorder %s2664_s30, %s2664_s30 }
 0x284   :  { %2616 = vmatprep.subr.bf16.mxu0 %v2913_v21  ;;  %v834_v21 = vld [vmem:[#allocation10 + $0x2d8] sm:$0xff]  ;;  %p3244_p11 = scmp.ne.s32.totalorder %s2664_s30, %s3243_s8  ;;  %p3249_p13 = scmp.lt.s32.totalorder %s3243_s8, %s3243_s8 }
 0x285   :  { %v2848_v36 = vcombine.low %v834_v21, %v838_v22 }
 0x286   :  { %2576 = vmatpush1.bf16.msra.mxu1 %v2784_v26  ;;  %v2984_v26 = vcombine.low %v970_v12, %v974_v17  ;;  %p3250_p0 = por %p3249_p13, %p3248_p12 }
 0x287   :  { %2617 = vmatpush1.bf16.msra.mxu0 %v2912_v27  ;;  %2577 = vmatprep.subr.bf16.mxu1 %v2777_v30  ;;  %v2849_v27 = vcombine.high %v834_v21, %v838_v22  ;;  %v2977_v30 = vcombine.high %v962_v23, %v966_v24 }
 0x288   :  { %2618 = vmatprep.subr.bf16.mxu0 %v2905_v32  ;;  %v826_v32 = vld [vmem:[#allocation10 + $0x298] sm:$0xff]  ;;  %p3251_p1 = pnand %p3250_p0, %p3244_p11 }
 0x289   :  { %v2840_v44 = vcombine.low %v826_v32, %v830_v33 }
 0x28a   :  { %2578 = vmatpush1.bf16.msra.mxu1 %v2776_v37  ;;  %v2976_v37 = vcombine.low %v962_v23, %v966_v24  ;;  %v1019_v23 = vsub.s32 4, %v3339_v28 }
 0x28b   :  { %2619 = vmatpush1.bf16.msra.mxu0 %v2904_v38  ;;  %2579 = vmatprep.subr.bf16.mxu1 %v2769_v39  ;;  %v2841_v38 = vcombine.high %v826_v32, %v830_v33  ;;  %v2969_v39 = vcombine.high %v954_v34, %v958_v35 }
 0x28c   :  { %2620 = vmatprep.subr.bf16.mxu0 %v2897_v40  ;;  %v818_v40 = vld [vmem:[#allocation10 + $0x258] sm:$0xff]  ;;  %v1020_v24 = vrot.slane %v999_v60, %v1019_v23 }
 0x28d   :  { %v2832_v54 = vcombine.low %v818_v40, %v822_v41 }
 0x28e   :  { %2580 = vmatpush1.bf16.msra.mxu1 %v2768_v45  ;;  %v2968_v45 = vcombine.low %v954_v34, %v958_v35 }
 0x28f   :  { %2621 = vmatpush1.bf16.msra.mxu0 %v2896_v46  ;;  %2581 = vmatprep.subr.bf16.mxu1 %v2761_v47  ;;  %v2833_v46 = vcombine.high %v818_v40, %v822_v41  ;;  %v2961_v47 = vcombine.high %v946_v42, %v950_v43  ;;  %v1027_v40 = vsub.s32 6, %v3339_v28  ;;  %v1031_v41 = vsub.s32 7, %v3339_v28 }
 0x290   :  { %2622 = vmatprep.subr.bf16.mxu0 %v2889_v48  ;;  %v810_v48 = vld [vmem:[#allocation10 + $0x218] sm:$0xff] }
 0x292   :  { %2582 = vmatpush1.bf16.msra.mxu1 %v2760_v55  ;;  %v2960_v55 = vcombine.low %v946_v42, %v950_v43  ;;  %v1028_v42 = vrot.slane %v999_v60, %v1027_v40  ;;  %v1032_v43 = vrot.slane %v999_v60, %v1031_v41 }
 0x293   :  { %2623 = vmatpush1.bf16.msra.mxu0 %v2888_v56  ;;  %2583 = vmatprep.subr.bf16.mxu1 %v2881_v57  ;;  %v2825_v56 = vcombine.high %v810_v48, %v814_v49  ;;  %v2953_v57 = vcombine.high %v938_v51, %v942_v53 }
 0x294   :  { %2624 = vmatprep.subr.bf16.mxu0 %v3009_v58  ;;  %v2824_v58 = vcombine.low %v810_v48, %v814_v49 }
 0x296   :  { %2584 = vmatpush2.bf16.msra.mxu1 %v2880_v63 }
 0x297   :  { %2625 = vmatpush2.bf16.msra.mxu0 %v3008_v0  ;;  %2585 = vmatprep.subr.bf16.mxu1 %v2873_v1 }
 0x298   :  { %2626 = vmatprep.subr.bf16.mxu0 %v3001_v2 }
 0x29a   :  { %2586 = vmatpush2.bf16.msra.mxu1 %v2872_v7 }
 0x29b   :  { %2627 = vmatpush2.bf16.msra.mxu0 %v3000_v8  ;;  %2587 = vmatprep.subr.bf16.mxu1 %v2865_v9 }
 0x29c   :  { %2628 = vmatprep.subr.bf16.mxu0 %v2993_v10 }
 0x29e   :  { %2588 = vmatpush2.bf16.msra.mxu1 %v2864_v18 }
 0x29f   :  { %2629 = vmatpush2.bf16.msra.mxu0 %v2992_v14  ;;  %2589 = vmatprep.subr.bf16.mxu1 %v2857_v19 }
 0x2a0   :  { %2630 = vmatprep.subr.bf16.mxu0 %v2985_v20 }
 0x2a2   :  { %2590 = vmatpush2.bf16.msra.mxu1 %v2856_v25 }
 0x2a3   :  { %2631 = vmatpush2.bf16.msra.mxu0 %v2984_v26  ;;  %2591 = vmatprep.subr.bf16.mxu1 %v2849_v27 }
 0x2a4   :  { %2632 = vmatprep.subr.bf16.mxu0 %v2977_v30 }
 0x2a6   :  { %2592 = vmatpush2.bf16.msra.mxu1 %v2848_v36 }
 0x2a7   :  { %2633 = vmatpush2.bf16.msra.mxu0 %v2976_v37  ;;  %2593 = vmatprep.subr.bf16.mxu1 %v2841_v38 }
 0x2a8   :  { %2634 = vmatprep.subr.bf16.mxu0 %v2969_v39 }
 0x2aa   :  { %2594 = vmatpush2.bf16.msra.mxu1 %v2840_v44 }
 0x2ab   :  { %2635 = vmatpush2.bf16.msra.mxu0 %v2968_v45  ;;  %2595 = vmatprep.subr.bf16.mxu1 %v2833_v46 }
 0x2ac   :  { %2636 = vmatprep.subr.bf16.mxu0 %v2961_v47 }
 0x2ae   :  { %2596 = vmatpush2.bf16.msra.mxu1 %v2832_v54 }
 0x2af   :  { %2637 = vmatpush2.bf16.msra.mxu0 %v2960_v55  ;;  %2597 = vmatprep.subr.bf16.mxu1 %v2825_v56 }
 0x2b0   :  { %2638 = vmatprep.subr.bf16.mxu0 %v2953_v57 }
 0x2b2   :  { %2598 = vmatpush2.bf16.msra.mxu1 %v2824_v58 }
 0x2b3   :  { %2639 = vmatpush2.bf16.msra.mxu0 %v2952_v59 }
 0x2b5   :  { %2600 = vmatmul.mubr.bf16.vlgmr.msra.gmra.mxu1 %v3364_v15  ;;  %v2355_v63 = vpop.f32.mrf.mxu1  ;;  %v2396_v0 = vpop.f32.mrf.mxu0  ;;  %v1016_v15 = vrot.slane %v999_v60, %v327_v52  ;;  %v1024_v52 = vrot.slane %v999_v60, %v1023_v50 }
 0x2b6   :  { %2641 = vmatmul.mubr.bf16.vlgmr.msra.gmra.mxu0 %v3366_v16  ;;  %v2356_v1 = vadd.f32 %v2355_v63, %v1004_v61 }
 0x2b7   :  { %v2357_v2 = vpop.f32.mrf.mxu1  ;;  %v2398_v3 = vpop.f32.mrf.mxu0 }
 0x2b8   :  { %v2397_v4 = vadd.f32 %v2396_v0, %v2356_v1  ;;  %v2358_v5 = vadd.f32 %v2357_v2, %v1008_v62 }
 0x2b9   :  { %v2359_v6 = vpop.f32.mrf.mxu1  ;;  %v2400_v7 = vpop.f32.mrf.mxu0 }
 0x2ba   :  { %2649 = vst [vmem:[#allocation11] sm:$0xff] %v2397_v4  ;;  %v2399_v8 = vadd.f32 %v2398_v3, %v2358_v5 }
 0x2bb   :  { %v2360_v9 = vpop.f32.mrf.mxu1  ;;  %v2401_v29 = vpop.f32.mrf.mxu0 }
 0x2bc   :  { %2650 = vst [vmem:[#allocation11 + $0x8] sm:$0xff] %v2399_v8 }
 0x2f5   :  { %v2437_v10 = vpop.f32.mrf.mxu1  ;;  %v2478_v16 = vpop.f32.mrf.mxu0 }
 0x2f6   :  { %v2438_v13 = vadd.f32 %v2437_v10, %v1012_v31 }
 0x2f7   :  { %v2439_v11 = vpop.f32.mrf.mxu1  ;;  %v2480_v12 = vpop.f32.mrf.mxu0 }
 0x2f8   :  { %v2479_v17 = vadd.f32 %v2478_v16, %v2438_v13  ;;  %v2440_v18 = vadd.f32 %v2439_v11, %v1016_v15 }
 0x2f9   :  { %v2441_v14 = vpop.f32.mrf.mxu1  ;;  %v2482_v19 = vpop.f32.mrf.mxu0 }
 0x2fa   :  { %2651 = vst [vmem:[#allocation11 + $0x10] sm:$0xff] %v2479_v17  ;;  %v2481_v20 = vadd.f32 %v2480_v12, %v2440_v18 }
 0x2fb   :  { %v2442_v21 = vpop.f32.mrf.mxu1  ;;  %v2483_v22 = vpop.f32.mrf.mxu0 }
 0x2fc   :  { %2652 = vst [vmem:[#allocation11 + $0x18] sm:$0xff] %v2481_v20 }
 0x335   :  { %v2519_v25 = vpop.f32.mrf.mxu1 }
 0x336   :  { %v2520_v26 = vadd.f32 %v2519_v25, %v1020_v24  ;;  %v2560_v27 = vpop.f32.mrf.mxu0 }
 0x337   :  { %v2521_v30 = vpop.f32.mrf.mxu1 }
 0x338   :  { %v2561_v32 = vadd.f32 %v2560_v27, %v2520_v26  ;;  %v2522_v33 = vadd.f32 %v2521_v30, %v1024_v52  ;;  %v2562_v34 = vpop.f32.mrf.mxu0 }
 0x339   :  { %v2523_v35 = vpop.f32.mrf.mxu1 }
 0x33a   :  { %2653 = vst [vmem:[#allocation11 + $0x20] sm:$0xff] %v2561_v32  ;;  %v2563_v36 = vadd.f32 %v2562_v34, %v2522_v33  ;;  %v2564_v37 = vpop.f32.mrf.mxu0 }
 0x33b   :  { %v2524_v38 = vpop.f32.mrf.mxu1 }
 0x33c   :  { %2654 = vst [vmem:[#allocation11 + $0x28] sm:$0xff] %v2563_v36  ;;  %v2565_v39 = vpop.f32.mrf.mxu0 }
 0x375   :  { %v2601_v44 = vpop.f32.mrf.mxu1 }
 0x376   :  { %v2602_v45 = vadd.f32 %v2601_v44, %v1028_v42  ;;  %v2642_v46 = vpop.f32.mrf.mxu0 }
 0x377   :  { %v2603_v47 = vpop.f32.mrf.mxu1 }
 0x378   :  { %v2643_v48 = vadd.f32 %v2642_v46, %v2602_v45  ;;  %v2604_v49 = vadd.f32 %v2603_v47, %v1032_v43  ;;  %v2644_v51 = vpop.f32.mrf.mxu0 }
 0x379   :  { %v2605_v53 = vpop.f32.mrf.mxu1 }
 0x37a   :  { %2655 = vst [vmem:[#allocation11 + $0x30] sm:$0xff] %v2643_v48  ;;  %v2645_v54 = vadd.f32 %v2644_v51, %v2604_v49  ;;  %v2646_v55 = vpop.f32.mrf.mxu0 }
 0x37b   :  { %v2606_v56 = vpop.f32.mrf.mxu1 }
 0x37c   :  { %2656 = vst [vmem:[#allocation11 + $0x38] sm:$0xff] %v2645_v54  ;;  %v2647_v57 = vpop.f32.mrf.mxu0 }
 0x37d   :  { %3254 = shalt.err (!%p3251_p1)
}
 0x37e   :  { %2666 = dma.vmem_to_hbm [thread:$0]  %s2664_s30, 1024, %s3407_s7, [#allocation4]  }
 0x37f   :  { %3269 = dma.done.wait [#allocation4], 1024  }
 0x380   :  { %3270 = vsyncadd [#allocation4], 4294966272 }
 0x381   :  { %2670 = vsyncpa [#allocation3], 1 }
 0x382   :  { %2671 = vsyncpa [#allocation6], 1 }
 0x383   :  { %2672 = vsyncpa [#allocation9], 1 }
 0x384   :  { %2673 = vsyncpa [#allocation4], 1 }

</bundles_post_ra>
